<compile_context>
chip_gen: v7x
topology: tpu7x:2x2x1
jax: 0.10.0
libtpu: 0.0.40
codegen_flags: <defaults>
</compile_context>

<pallas_src>
import functools

import jax
import jax.numpy as jnp
from jax import lax
from jax.experimental import pallas as pl
from jax.experimental.pallas import tpu as pltpu

KH = KW = 4
STRIDE = 2
PAD = 1
EPS = 1e-5

# ConvTranspose2d(k=4, s=2, p=1) tap/phase decomposition:
#   out[:, :, 2i+ph, 2j+pw] =
#       sum over (kh, r) in _ROW_TAPS[ph], (kw, c) in _COL_TAPS[pw]
#           of xp[:, i+r, j+c, :] @ W[:, :, kh, kw]
# where xp is x zero-padded by 1 on each spatial side (NHWC layout).
_ROW_TAPS = {0: ((1, 1), (3, 0)),   # even output rows: (kh, padded-row offset r)
             1: ((0, 2), (2, 1))}   # odd  output rows
_COL_TAPS = _ROW_TAPS               # identical structure for columns
_PHASES = ((0, 0), (0, 1), (1, 0), (1, 1))   # phase index p = ph*2 + pw


def _deconv_stats_kernel(xp_ref, w_ref, b_ref, y_ref, stats_ref, *, H, W, C_in, C_out):
    """Pass 1: per-phase im2col matmuls (un-normalized deconv output packed
    lane-dense as (rows, 4*C_out)) + per-tile per-channel sum / sum-of-squares."""
    tb = xp_ref.shape[0]
    M = tb * H * W
    xp = xp_ref[...]                                   # (tb, H+2, W+2, C_in)
    bias = b_ref[...]                                  # (1, C_out)

    s_acc = jnp.zeros((1, C_out), jnp.float32)
    s2_acc = jnp.zeros((1, C_out), jnp.float32)
    for p, (ph, pw) in enumerate(_PHASES):
        # 2x2 receptive-field im2col patch for this phase (order matches weights).
        parts = []
        for _, r in _ROW_TAPS[ph]:
            for _, c in _COL_TAPS[pw]:
                parts.append(xp[:, r:r + H, c:c + W, :])
        patch = jnp.concatenate(parts, axis=-1).reshape(M, 4 * C_in)
        yp = jnp.dot(patch, w_ref[p], preferred_element_type=jnp.float32) + bias
        # Store each phase directly into its lane block (no stacked temporary).
        y_ref[:, p * C_out:(p + 1) * C_out] = yp
        s_acc = s_acc + jnp.sum(yp, axis=0, keepdims=True)
        s2_acc = s2_acc + jnp.sum(yp * yp, axis=0, keepdims=True)

    stats_ref[...] = jnp.concatenate([s_acc, s2_acc], axis=0)[None]   # (1, 2, C_out)


def _bn_apply_kernel(y_ref, scale_ref, shift_ref, o_ref):
    """Pass 2: in-place affine normalization (output aliased to the y input)."""
    o_ref[...] = y_ref[...] * scale_ref[...] + shift_ref[...]


def _pack_weights(weight):
    """(C_in, C_out, 4, 4) torch ConvTranspose2d layout -> (4, 4*C_in, C_out):
    one (4*C_in, C_out) im2col weight per output phase (no tap duplication)."""
    w_phases = []
    for ph, pw in _PHASES:
        blocks = []
        for kh, _ in _ROW_TAPS[ph]:
            for kw, _ in _COL_TAPS[pw]:
                blocks.append(weight[:, :, kh, kw])        # (C_in, C_out)
        w_phases.append(jnp.concatenate(blocks, axis=0))   # (4*C_in, C_out)
    return jnp.stack(w_phases, axis=0)                     # (4, 4*C_in, C_out)


def _pick_batch_tile(B, H, W, C_in, C_out, budget_bytes=24 << 20):
    """Largest whole-image batch tile whose double-buffered working set fits."""
    def tile_bytes(tb):
        xp_b = tb * (H + 2) * (W + 2) * C_in * 4
        y_b = tb * H * W * 4 * C_out * 4
        patch_b = tb * H * W * 4 * C_in * 4    # one phase patch live at a time
        phase_b = tb * H * W * C_out * 4
        return 2 * (xp_b + y_b) + patch_b + phase_b
    tb = B
    while tb > 1 and (B % tb != 0 or tile_bytes(tb) > budget_bytes):
        tb -= 1
    return tb


def g_de_block_forward(x, weight, bias, gamma, beta, *, batch_tile=None):
    """x: (B, C_in, H, W) f32; weight: (C_in, C_out, 4, 4) torch layout.
    Returns ConvTranspose2d(k=4,s=2,p=1) + training-mode BatchNorm2d output."""
    B, C_in, H, W = x.shape
    C_out = weight.shape[1]
    tb = batch_tile if batch_tile is not None else _pick_batch_tile(B, H, W, C_in, C_out)
    assert B % tb == 0
    n_tiles = B // tb
    tm = tb * H * W

    # Layout plumbing stays in the wrapper: NCHW -> padded NHWC, packed weights.
    xp = jnp.pad(jnp.transpose(x, (0, 2, 3, 1)), ((0, 0), (1, 1), (1, 1), (0, 0)))
    w_packed = _pack_weights(weight)

    cparams = pltpu.CompilerParams(dimension_semantics=("parallel",),
                                   vmem_limit_bytes=48 << 20)

    # Pass 1: tiled deconv (per-phase im2col matmuls) + per-tile BN partial stats.
    kernel1 = functools.partial(_deconv_stats_kernel, H=H, W=W, C_in=C_in, C_out=C_out)
    y_raw, stats = pl.pallas_call(
        kernel1,
        out_shape=(jax.ShapeDtypeStruct((B * H * W, 4 * C_out), jnp.float32),
                   jax.ShapeDtypeStruct((n_tiles, 2, C_out), jnp.float32)),
        grid=(n_tiles,),
        in_specs=[pl.BlockSpec((tb, H + 2, W + 2, C_in), lambda i: (i, 0, 0, 0)),
                  pl.BlockSpec((4, 4 * C_in, C_out), lambda i: (0, 0, 0)),
                  pl.BlockSpec((1, C_out), lambda i: (0, 0))],
        out_specs=(pl.BlockSpec((tm, 4 * C_out), lambda i: (i, 0)),
                   pl.BlockSpec((1, 2, C_out), lambda i: (i, 0, 0))),
        compiler_params=cparams,
    )(xp, w_packed, bias.reshape(1, C_out))

    # Tiny per-channel reduction + affine coefficients (cheap, stays in XLA).
    n = jnp.float32(B * (STRIDE * H) * (STRIDE * W))
    s = jnp.sum(stats[:, 0, :], axis=0)
    s2 = jnp.sum(stats[:, 1, :], axis=0)
    mean = s / n
    var = jnp.maximum(s2 / n - mean * mean, 0.0)          # biased var (torch BN norm)
    scale = gamma * lax.rsqrt(var + EPS)
    shift = beta - mean * scale
    scale_p = jnp.tile(scale, 4).reshape(1, 4 * C_out)     # per lane-packed phase copy
    shift_p = jnp.tile(shift, 4).reshape(1, 4 * C_out)

    # Pass 2: apply scale/shift in place (y_raw aliased into the output buffer).
    y_norm = pl.pallas_call(
        _bn_apply_kernel,
        out_shape=jax.ShapeDtypeStruct((B * H * W, 4 * C_out), jnp.float32),
        grid=(n_tiles,),
        in_specs=[pl.BlockSpec((tm, 4 * C_out), lambda i: (i, 0)),
                  pl.BlockSpec((1, 4 * C_out), lambda i: (0, 0)),
                  pl.BlockSpec((1, 4 * C_out), lambda i: (0, 0))],
        out_specs=pl.BlockSpec((tm, 4 * C_out), lambda i: (i, 0)),
        compiler_params=cparams,
        input_output_aliases={0: 0},
    )(y_raw, scale_p, shift_p)

    # (b*H*W + i*W + j, (ph*2+pw)*C_out + c)  ->  (b, c, 2i+ph, 2j+pw)
    y = y_norm.reshape(B, H, W, 2, 2, C_out)
    y = jnp.transpose(y, (0, 5, 1, 3, 2, 4)).reshape(B, C_out, STRIDE * H, STRIDE * W)
    return y


def g_de_block_reference(x, weight, bias, gamma, beta):
    """Pure-JAX reference: ConvTranspose2d (as dilated correlation) + training-mode BN."""
    w_oihw = jnp.transpose(jnp.flip(weight, axis=(2, 3)), (1, 0, 2, 3))
    y = lax.conv_general_dilated(
        x, w_oihw, window_strides=(1, 1),
        padding=((KH - 1 - PAD,) * 2, (KW - 1 - PAD,) * 2),
        lhs_dilation=(STRIDE, STRIDE),
        dimension_numbers=("NCHW", "OIHW", "NCHW"),
        precision=lax.Precision.HIGHEST)
    y = y + bias[None, :, None, None]
    mu = jnp.mean(y, axis=(0, 2, 3), keepdims=True)
    var = jnp.var(y, axis=(0, 2, 3), keepdims=True)
    return (y - mu) * lax.rsqrt(var + EPS) * gamma[None, :, None, None] \
        + beta[None, :, None, None]


if __name__ == "__main__":
    B, C_in, C_out, H, W = 2, 8, 16, 8, 8
    key = jax.random.PRNGKey(0)
    kx, kw, kb, kg, kbt = jax.random.split(key, 5)
    x = jax.random.normal(kx, (B, C_in, H, W), jnp.float32)
    weight = 0.1 * jax.random.normal(kw, (C_in, C_out, KH, KW), jnp.float32)
    bias = 0.1 * jax.random.normal(kb, (C_out,), jnp.float32)
    gamma = 1.0 + 0.1 * jax.random.normal(kg, (C_out,), jnp.float32)
    beta = 0.1 * jax.random.normal(kbt, (C_out,), jnp.float32)

    # batch_tile=1 exercises the grid (2 steps) even at this toy size.
    out = jax.block_until_ready(
        g_de_block_forward(x, weight, bias, gamma, beta, batch_tile=1))
    assert out.shape == (B, C_out, STRIDE * H, STRIDE * W) and out.dtype == jnp.float32
    assert bool(jnp.all(jnp.isfinite(out)))

    ref = jax.block_until_ready(g_de_block_reference(x, weight, bias, gamma, beta))
    err = float(jnp.max(jnp.abs(out - ref)))
    assert err < 2e-3, f"max abs error vs reference: {err}"
    print("KERNEL_OK")
</pallas_src>

<mosaic_0001>
module attributes {stable_mosaic.version = 11 : i64} {
  func.func @_deconv_stats_kernel(%arg0: i32, %arg1: memref<1x10x10x8xf32, #tpu.memory_space<vmem>>, %arg2: memref<4x32x16xf32, #tpu.memory_space<vmem>>, %arg3: memref<1x16xf32, #tpu.memory_space<vmem>>, %arg4: memref<64x64xf32, #tpu.memory_space<vmem>>, %arg5: memref<1x2x16xf32, #tpu.memory_space<vmem>>) attributes {dimension_semantics = [#tpu.dimension_semantics<parallel>], iteration_bounds = array<i64: 2>, scalar_prefetch = 0 : i64, scratch_operands = 0 : i64, tpu.core_type = #tpu.core_type<tc>, window_params = [{transform_indices = @transform_0, window_bounds = array<i64: 1, 10, 10, 8>}, {pipeline_mode = #tpu.pipeline_mode<synchronous>, transform_indices = @transform_1, window_bounds = array<i64: 4, 32, 16>}, {pipeline_mode = #tpu.pipeline_mode<synchronous>, transform_indices = @transform_2, window_bounds = array<i64: 1, 16>}, {transform_indices = @transform_3, window_bounds = array<i64: 64, 64>}, {transform_indices = @transform_4, window_bounds = array<i64: 1, 2, 16>}]} {
    %c0 = arith.constant 0 : index
    %c0_0 = arith.constant 0 : index
    %c0_1 = arith.constant 0 : index
    %c0_2 = arith.constant 0 : index
    %0 = vector.load %arg1[%c0, %c0_0, %c0_1, %c0_2] : memref<1x10x10x8xf32, #tpu.memory_space<vmem>>, vector<1x10x10x8xf32>
    %c0_3 = arith.constant 0 : index
    %c0_4 = arith.constant 0 : index
    %1 = vector.load %arg3[%c0_3, %c0_4] : memref<1x16xf32, #tpu.memory_space<vmem>>, vector<1x16xf32>
    %cst = arith.constant 0.000000e+00 : f32
    %2 = vector.broadcast %cst : f32 to vector<1x16xf32>
    %cst_5 = arith.constant 0.000000e+00 : f32
    %3 = vector.broadcast %cst_5 : f32 to vector<1x16xf32>
    %4 = vector.extract_strided_slice %0 {offsets = [0, 1, 1, 0], sizes = [1, 8, 8, 8], strides = [1, 1, 1, 1]} : vector<1x10x10x8xf32> to vector<1x8x8x8xf32>
    %5 = vector.extract_strided_slice %0 {offsets = [0, 1, 0, 0], sizes = [1, 8, 8, 8], strides = [1, 1, 1, 1]} : vector<1x10x10x8xf32> to vector<1x8x8x8xf32>
    %6 = vector.extract_strided_slice %0 {offsets = [0, 0, 1, 0], sizes = [1, 8, 8, 8], strides = [1, 1, 1, 1]} : vector<1x10x10x8xf32> to vector<1x8x8x8xf32>
    %7 = vector.extract_strided_slice %0 {offsets = [0, 0, 0, 0], sizes = [1, 8, 8, 8], strides = [1, 1, 1, 1]} : vector<1x10x10x8xf32> to vector<1x8x8x8xf32>
    %8 = tpu.concatenate %4, %5, %6, %7 in 3 : vector<1x8x8x8xf32>, vector<1x8x8x8xf32>, vector<1x8x8x8xf32>, vector<1x8x8x8xf32> -> vector<1x8x8x32xf32>
    %9 = vector.shape_cast %8 : vector<1x8x8x32xf32> to vector<64x32xf32>
    %c0_6 = arith.constant 0 : index
    %c0_7 = arith.constant 0 : index
    %c0_8 = arith.constant 0 : index
    %10 = vector.load %arg2[%c0_6, %c0_7, %c0_8] : memref<4x32x16xf32, #tpu.memory_space<vmem>>, vector<1x32x16xf32>
    %11 = vector.shape_cast %10 : vector<1x32x16xf32> to vector<32x16xf32>
    %cst_9 = arith.constant dense<0.000000e+00> : vector<64x16xf32>
    %12 = tpu.matmul %9, %11, %cst_9 {dimension_numbers = #tpu.dot_dimension_numbers<[1], [0], [0], [1], [0, 0, 1, 1], [], []>} : vector<64x32xf32>, vector<32x16xf32>, vector<64x16xf32> -> vector<64x16xf32>
    %13 = vector.broadcast %1 : vector<1x16xf32> to vector<64x16xf32>
    %14 = arith.addf %12, %13 : vector<64x16xf32>
    %c0_10 = arith.constant 0 : index
    %c0_11 = arith.constant 0 : index
    %15 = vector.load %arg4[%c0_10, %c0_11] : memref<64x64xf32, #tpu.memory_space<vmem>>, vector<64x16xf32>
    tpu.vector_store %arg4[%c0_10, %c0_11], %14 {strides = array<i32>} : memref<64x64xf32, #tpu.memory_space<vmem>>, vector<64x16xf32>,
    %cst_12 = arith.constant dense<0.000000e+00> : vector<16xf32>
    %16 = vector.multi_reduction <add>, %14, %cst_12 [0] : vector<64x16xf32> to vector<16xf32>
    %17 = vector.shape_cast %16 : vector<16xf32> to vector<1x16xf32>
    %18 = arith.addf %2, %17 : vector<1x16xf32>
    %19 = arith.mulf %14, %14 : vector<64x16xf32>
    %cst_13 = arith.constant dense<0.000000e+00> : vector<16xf32>
    %20 = vector.multi_reduction <add>, %19, %cst_13 [0] : vector<64x16xf32> to vector<16xf32>
    %21 = vector.shape_cast %20 : vector<16xf32> to vector<1x16xf32>
    %22 = arith.addf %3, %21 : vector<1x16xf32>
    %23 = vector.extract_strided_slice %0 {offsets = [0, 1, 2, 0], sizes = [1, 8, 8, 8], strides = [1, 1, 1, 1]} : vector<1x10x10x8xf32> to vector<1x8x8x8xf32>
    %24 = vector.extract_strided_slice %0 {offsets = [0, 1, 1, 0], sizes = [1, 8, 8, 8], strides = [1, 1, 1, 1]} : vector<1x10x10x8xf32> to vector<1x8x8x8xf32>
    %25 = vector.extract_strided_slice %0 {offsets = [0, 0, 2, 0], sizes = [1, 8, 8, 8], strides = [1, 1, 1, 1]} : vector<1x10x10x8xf32> to vector<1x8x8x8xf32>
    %26 = vector.extract_strided_slice %0 {offsets = [0, 0, 1, 0], sizes = [1, 8, 8, 8], strides = [1, 1, 1, 1]} : vector<1x10x10x8xf32> to vector<1x8x8x8xf32>
    %27 = tpu.concatenate %23, %24, %25, %26 in 3 : vector<1x8x8x8xf32>, vector<1x8x8x8xf32>, vector<1x8x8x8xf32>, vector<1x8x8x8xf32> -> vector<1x8x8x32xf32>
    %28 = vector.shape_cast %27 : vector<1x8x8x32xf32> to vector<64x32xf32>
    %c1 = arith.constant 1 : index
    %c0_14 = arith.constant 0 : index
    %c0_15 = arith.constant 0 : index
    %29 = vector.load %arg2[%c1, %c0_14, %c0_15] : memref<4x32x16xf32, #tpu.memory_space<vmem>>, vector<1x32x16xf32>
    %30 = vector.shape_cast %29 : vector<1x32x16xf32> to vector<32x16xf32>
    %cst_16 = arith.constant dense<0.000000e+00> : vector<64x16xf32>
    %31 = tpu.matmul %28, %30, %cst_16 {dimension_numbers = #tpu.dot_dimension_numbers<[1], [0], [0], [1], [0, 0, 1, 1], [], []>} : vector<64x32xf32>, vector<32x16xf32>, vector<64x16xf32> -> vector<64x16xf32>
    %32 = vector.broadcast %1 : vector<1x16xf32> to vector<64x16xf32>
    %33 = arith.addf %31, %32 : vector<64x16xf32>
    %c0_17 = arith.constant 0 : index
    %c16 = arith.constant 16 : index
    %34 = vector.load %arg4[%c0_17, %c16] : memref<64x64xf32, #tpu.memory_space<vmem>>, vector<64x16xf32>
    tpu.vector_store %arg4[%c0_17, %c16], %33 {strides = array<i32>} : memref<64x64xf32, #tpu.memory_space<vmem>>, vector<64x16xf32>,
    %cst_18 = arith.constant dense<0.000000e+00> : vector<16xf32>
    %35 = vector.multi_reduction <add>, %33, %cst_18 [0] : vector<64x16xf32> to vector<16xf32>
    %36 = vector.shape_cast %35 : vector<16xf32> to vector<1x16xf32>
    %37 = arith.addf %18, %36 : vector<1x16xf32>
    %38 = arith.mulf %33, %33 : vector<64x16xf32>
    %cst_19 = arith.constant dense<0.000000e+00> : vector<16xf32>
    %39 = vector.multi_reduction <add>, %38, %cst_19 [0] : vector<64x16xf32> to vector<16xf32>
    %40 = vector.shape_cast %39 : vector<16xf32> to vector<1x16xf32>
    %41 = arith.addf %22, %40 : vector<1x16xf32>
    %42 = vector.extract_strided_slice %0 {offsets = [0, 2, 1, 0], sizes = [1, 8, 8, 8], strides = [1, 1, 1, 1]} : vector<1x10x10x8xf32> to vector<1x8x8x8xf32>
    %43 = vector.extract_strided_slice %0 {offsets = [0, 2, 0, 0], sizes = [1, 8, 8, 8], strides = [1, 1, 1, 1]} : vector<1x10x10x8xf32> to vector<1x8x8x8xf32>
    %44 = vector.extract_strided_slice %0 {offsets = [0, 1, 1, 0], sizes = [1, 8, 8, 8], strides = [1, 1, 1, 1]} : vector<1x10x10x8xf32> to vector<1x8x8x8xf32>
    %45 = vector.extract_strided_slice %0 {offsets = [0, 1, 0, 0], sizes = [1, 8, 8, 8], strides = [1, 1, 1, 1]} : vector<1x10x10x8xf32> to vector<1x8x8x8xf32>
    %46 = tpu.concatenate %42, %43, %44, %45 in 3 : vector<1x8x8x8xf32>, vector<1x8x8x8xf32>, vector<1x8x8x8xf32>, vector<1x8x8x8xf32> -> vector<1x8x8x32xf32>
    %47 = vector.shape_cast %46 : vector<1x8x8x32xf32> to vector<64x32xf32>
    %c2 = arith.constant 2 : index
    %c0_20 = arith.constant 0 : index
    %c0_21 = arith.constant 0 : index
    %48 = vector.load %arg2[%c2, %c0_20, %c0_21] : memref<4x32x16xf32, #tpu.memory_space<vmem>>, vector<1x32x16xf32>
    %49 = vector.shape_cast %48 : vector<1x32x16xf32> to vector<32x16xf32>
    %cst_22 = arith.constant dense<0.000000e+00> : vector<64x16xf32>
    %50 = tpu.matmul %47, %49, %cst_22 {dimension_numbers = #tpu.dot_dimension_numbers<[1], [0], [0], [1], [0, 0, 1, 1], [], []>} : vector<64x32xf32>, vector<32x16xf32>, vector<64x16xf32> -> vector<64x16xf32>
    %51 = vector.broadcast %1 : vector<1x16xf32> to vector<64x16xf32>
    %52 = arith.addf %50, %51 : vector<64x16xf32>
    %c0_23 = arith.constant 0 : index
    %c32 = arith.constant 32 : index
    %53 = vector.load %arg4[%c0_23, %c32] : memref<64x64xf32, #tpu.memory_space<vmem>>, vector<64x16xf32>
    tpu.vector_store %arg4[%c0_23, %c32], %52 {strides = array<i32>} : memref<64x64xf32, #tpu.memory_space<vmem>>, vector<64x16xf32>,
    %cst_24 = arith.constant dense<0.000000e+00> : vector<16xf32>
    %54 = vector.multi_reduction <add>, %52, %cst_24 [0] : vector<64x16xf32> to vector<16xf32>
    %55 = vector.shape_cast %54 : vector<16xf32> to vector<1x16xf32>
    %56 = arith.addf %37, %55 : vector<1x16xf32>
    %57 = arith.mulf %52, %52 : vector<64x16xf32>
    %cst_25 = arith.constant dense<0.000000e+00> : vector<16xf32>
    %58 = vector.multi_reduction <add>, %57, %cst_25 [0] : vector<64x16xf32> to vector<16xf32>
    %59 = vector.shape_cast %58 : vector<16xf32> to vector<1x16xf32>
    %60 = arith.addf %41, %59 : vector<1x16xf32>
    %61 = vector.extract_strided_slice %0 {offsets = [0, 2, 2, 0], sizes = [1, 8, 8, 8], strides = [1, 1, 1, 1]} : vector<1x10x10x8xf32> to vector<1x8x8x8xf32>
    %62 = vector.extract_strided_slice %0 {offsets = [0, 2, 1, 0], sizes = [1, 8, 8, 8], strides = [1, 1, 1, 1]} : vector<1x10x10x8xf32> to vector<1x8x8x8xf32>
    %63 = vector.extract_strided_slice %0 {offsets = [0, 1, 2, 0], sizes = [1, 8, 8, 8], strides = [1, 1, 1, 1]} : vector<1x10x10x8xf32> to vector<1x8x8x8xf32>
    %64 = vector.extract_strided_slice %0 {offsets = [0, 1, 1, 0], sizes = [1, 8, 8, 8], strides = [1, 1, 1, 1]} : vector<1x10x10x8xf32> to vector<1x8x8x8xf32>
    %65 = tpu.concatenate %61, %62, %63, %64 in 3 : vector<1x8x8x8xf32>, vector<1x8x8x8xf32>, vector<1x8x8x8xf32>, vector<1x8x8x8xf32> -> vector<1x8x8x32xf32>
    %66 = vector.shape_cast %65 : vector<1x8x8x32xf32> to vector<64x32xf32>
    %c3 = arith.constant 3 : index
    %c0_26 = arith.constant 0 : index
    %c0_27 = arith.constant 0 : index
    %67 = vector.load %arg2[%c3, %c0_26, %c0_27] : memref<4x32x16xf32, #tpu.memory_space<vmem>>, vector<1x32x16xf32>
    %68 = vector.shape_cast %67 : vector<1x32x16xf32> to vector<32x16xf32>
    %cst_28 = arith.constant dense<0.000000e+00> : vector<64x16xf32>
    %69 = tpu.matmul %66, %68, %cst_28 {dimension_numbers = #tpu.dot_dimension_numbers<[1], [0], [0], [1], [0, 0, 1, 1], [], []>} : vector<64x32xf32>, vector<32x16xf32>, vector<64x16xf32> -> vector<64x16xf32>
    %70 = vector.broadcast %1 : vector<1x16xf32> to vector<64x16xf32>
    %71 = arith.addf %69, %70 : vector<64x16xf32>
    %c0_29 = arith.constant 0 : index
    %c48 = arith.constant 48 : index
    %72 = vector.load %arg4[%c0_29, %c48] : memref<64x64xf32, #tpu.memory_space<vmem>>, vector<64x16xf32>
    tpu.vector_store %arg4[%c0_29, %c48], %71 {strides = array<i32>} : memref<64x64xf32, #tpu.memory_space<vmem>>, vector<64x16xf32>,
    %cst_30 = arith.constant dense<0.000000e+00> : vector<16xf32>
    %73 = vector.multi_reduction <add>, %71, %cst_30 [0] : vector<64x16xf32> to vector<16xf32>
    %74 = vector.shape_cast %73 : vector<16xf32> to vector<1x16xf32>
    %75 = arith.addf %56, %74 : vector<1x16xf32>
    %76 = arith.mulf %71, %71 : vector<64x16xf32>
    %cst_31 = arith.constant dense<0.000000e+00> : vector<16xf32>
    %77 = vector.multi_reduction <add>, %76, %cst_31 [0] : vector<64x16xf32> to vector<16xf32>
    %78 = vector.shape_cast %77 : vector<16xf32> to vector<1x16xf32>
    %79 = arith.addf %60, %78 : vector<1x16xf32>
    %80 = tpu.concatenate %75, %79 in 0 : vector<1x16xf32>, vector<1x16xf32> -> vector<2x16xf32>
    %81 = vector.shape_cast %80 : vector<2x16xf32> to vector<1x2x16xf32>
    %c0_32 = arith.constant 0 : index
    %c0_33 = arith.constant 0 : index
    %c0_34 = arith.constant 0 : index
    %82 = vector.load %arg5[%c0_32, %c0_33, %c0_34] : memref<1x2x16xf32, #tpu.memory_space<vmem>>, vector<1x2x16xf32>
    tpu.vector_store %arg5[%c0_32, %c0_33, %c0_34], %81 {strides = array<i32>} : memref<1x2x16xf32, #tpu.memory_space<vmem>>, vector<1x2x16xf32>,
    return
  }
  func.func @transform_0(%arg0: i32) -> (i32, i32, i32, i32) {
    %c0_i32 = arith.constant 0 : i32
    %c0_i32_0 = arith.constant 0 : i32
    %c0_i32_1 = arith.constant 0 : i32
    %c0_i32_2 = arith.constant 0 : i32
    return %arg0, %c0_i32, %c0_i32_0, %c0_i32_1 : i32, i32, i32, i32
  }
  func.func @transform_1(%arg0: i32) -> (i32, i32, i32) {
    %c0_i32 = arith.constant 0 : i32
    %c0_i32_0 = arith.constant 0 : i32
    %c0_i32_1 = arith.constant 0 : i32
    %c0_i32_2 = arith.constant 0 : i32
    return %c0_i32, %c0_i32_0, %c0_i32_1 : i32, i32, i32
  }
  func.func @transform_2(%arg0: i32) -> (i32, i32) {
    %c0_i32 = arith.constant 0 : i32
    %c0_i32_0 = arith.constant 0 : i32
    %c0_i32_1 = arith.constant 0 : i32
    return %c0_i32, %c0_i32_0 : i32, i32
  }
  func.func @transform_3(%arg0: i32) -> (i32, i32) {
    %c0_i32 = arith.constant 0 : i32
    %c0_i32_0 = arith.constant 0 : i32
    return %arg0, %c0_i32 : i32, i32
  }
  func.func @transform_4(%arg0: i32) -> (i32, i32, i32) {
    %c0_i32 = arith.constant 0 : i32
    %c0_i32_0 = arith.constant 0 : i32
    %c0_i32_1 = arith.constant 0 : i32
    return %arg0, %c0_i32, %c0_i32_0 : i32, i32, i32
  }
}

</mosaic_0001>

<bundles_post_ra>
// kernel: tpu_custom_call.1
= control target key start
LH: loop header
LB: loop body
LE: loop exit
PB: predicated region body
PF: predicated region fallthrough
CT: control target
= control target key end

     0   :  { %10 = vsyncpa [#allocation3], 0  ;;  %s2626_s0 = inlined_call_operand.vmem [shape: f32[2,10,10,8], index: 0, kind: input, shape index: {}]   ;;  %s2627_s1 = inlined_call_operand.vmem [shape: f32[4,32,16], index: 1, kind: input, shape index: {}]   ;;  %s2628_s2 = inlined_call_operand.vmem [shape: f32[1,16], index: 2, kind: input, shape index: {}]   ;;  %s2629_s3 = inlined_call_operand.vmem [shape: f32[128,64], index: 3, kind: output, shape index: {0}]   ;;  %s2630_s4 = inlined_call_operand.hbm [shape: f32[2,2,16], index: 4, kind: output, shape index: {1}]  }
   0x1   :  { %12 = vsyncpa [#allocation3 + $0x1], 0  ;;  %s1899_s15 = smov 0   ;;  %s1901_s16 = smov 0  }
   0x2   :  { %s1903_s17 = smov 0   ;;  %s1905_s18 = smov 0  }
   0x3 LB: > { %s1920_s19 = sadd.s32 4294967295, %s1866_s18   ;;  %s1542_s20 = sadd.s32 4294967294, %s1866_s18   ;;  %s1866_s18 = sphi %s1905_s18, %s2636_s18   ;;  %s1862_s17 = sphi %s1903_s17, %s2635_s17   ;;  %s1858_s16 = sphi %s1901_s16, %s2634_s16   ;;  %s1854_s15 = sphi %s1899_s15, %s2633_s15  }
   0x4   : > { %s1924_s21 = sadd.s32 1, %s1866_s18   ;;  %s119_s22 = sadd.s32 1, %s1862_s17 }
   0x5   : > { %s116_s23 = ssub.s32 %s1866_s18, %s1924_s21  ;;  %p129_p0 = scmp.ne.s32.totalorder %s1862_s17, %s1858_s16 }
   0x6   : > { %p117_p1 = scmp.eq.s32.totalorder %s116_s23, 0  ;;  %p130_p2 = scmp.eq.s32.totalorder %s1920_s19, 1 }
   0x7   : > { %p135_p3 = scmp.ne.s32.totalorder %s1858_s16, %s1854_s15  ;;  %p136_p4 = scmp.eq.s32.totalorder %s1542_s20, 1 }
   0x8   : > { %s1935_s24 = scalar_select %p117_p1, %s1862_s17, %s119_s22  }
   0x9   : > { %p1937_p5 = por %p130_p2, %p129_p0  ;;  %p1941_p6 = por %p136_p4, %p135_p3 }
   0xa   : > { %p1545_p7 = scmp.ge.s32.totalorder %s1866_s18, 1  ;;  %p168_p8 = scmp.lt.s32.totalorder %s1866_s18, 3 }
   0xc   : > { %p169_p9 = pnand %p1545_p7, %p168_p8 }
   0xd   : > { %p199_p10 = scmp.lt.s32.totalorder (!%p169_p9), %s1920_s19, 1  ;;  %v445_v0 = vld [vmem:[%s2627_s1] sm:$0xff] (!%p169_p9)  ;;  %v446_v1 = vld [vmem:[%s2627_s1 + $0x8] sm:$0xff] (!%p169_p9)  ;;  %s1868_s10 = smov (!%p169_p9), 16   ;;  %vm638_vm0 = vcmask (!%p169_p9), 1040384   ;;  %v447_v11 = vld [vmem:[%s2627_s1 + $0x10] sm:$0xff] (!%p169_p9) }
   0xe   : > { %172 = sbr.rel (%p169_p9) target bundleno = 607 (0x25f), region = 32  ;;  %v1727_v2 = vpack.c.bf16 (!%p169_p9), %v446_v1, %v445_v0  ;;  %s1869_s11 = smov (!%p169_p9), 8   ;;  %v448_v13 = vld [vmem:[%s2627_s1 + $0x18] sm:$0xff] (!%p169_p9)  ;;  %v1559_v14 = vld [vmem:[%s2627_s1 + $0x20] sm:$0xff] (!%p169_p9)  ;;  %v1560_v18 = vld [vmem:[%s2627_s1 + $0x28] sm:$0xff] (!%p169_p9)  ;;  %vm353_vm1 = vcmask (!%p169_p9), 64512  }
   0xf   : > { %v1731_v17 = vpack.c.bf16 (!%p169_p9), %v448_v13, %v447_v11  ;;  %v1735_v19 = vpack.c.bf16 (!%p169_p9), %v1560_v18, %v1559_v14  ;;  %v1561_v20 = vld [vmem:[%s2627_s1 + $0x30] sm:$0xff] (!%p169_p9)  ;;  %v1562_v21 = vld [vmem:[%s2627_s1 + $0x38] sm:$0xff] (!%p169_p9)  ;;  %s1870_s7 = smov (!%p169_p9), 24   ;;  %v1571_v52 = vld [vmem:[%s2627_s1 + $0x40] sm:$0xff] (!%p169_p9)  ;;  %vm370_vm2 = vcmask (!%p169_p9), 130048   ;;  %vm387_vm3 = vcmask (!%p169_p9), 195584  }
  0x10   : > { %1728 = vmatprep.subr.bf16.mxu0 (!%p169_p9), %v1727_v2  ;;  %v1739_v23 = vpack.c.bf16 (!%p169_p9), %v1562_v21, %v1561_v20  ;;  %v1572_v53 = vld [vmem:[%s2627_s1 + $0x48] sm:$0xff] (!%p169_p9)  ;;  %v1583_v56 = vld [vmem:[%s2627_s1 + $0x60] sm:$0xff] (!%p169_p9)  ;;  %vm420_vm4 = vcmask (!%p169_p9), 1046528   ;;  %vm455_vm5 = vcmask (!%p169_p9), 261120   ;;  %vm737_vm6 = vcmask (!%p169_p9), 1045504   ;;  %s1548_s8 = sshll.u32 (!%p169_p9), %s1920_s19, 3 }
  0x11   : > { %1730 = vmatpush3.bf16.msra.mxu0 (!%p169_p9), %v1727_v2  ;;  %1736 = vmatprep.subr.bf16.mxu1 (!%p169_p9), %v1735_v19  ;;  %v2099_v54 = vpack.c.bf16 (!%p169_p9), %v1572_v53, %v1571_v52  ;;  %v1584_v57 = vld [vmem:[%s2627_s1 + $0x68] sm:$0xff] (!%p169_p9)  ;;  %p205_p11 = scmp.lt.s32.totalorder (!%p169_p9), %s1548_s8, 15  ;;  %vm920_vm7 = vcmask (!%p169_p9), 261248   ;;  %vm1433_vm8 = vcmask (!%p169_p9), 123904  }
  0x12   : > { %1732 = vmatprep.subr.bf16.mxu0 (!%p169_p9), %v1731_v17  ;;  %1738 = vmatpush3.bf16.msra.mxu1 (!%p169_p9), %v1735_v19  ;;  %v2114_v58 = vpack.c.bf16 (!%p169_p9), %v1584_v57, %v1583_v56 }
  0x13   : > { %1740 = vmatprep.subr.bf16.mxu1 (!%p169_p9), %v1739_v23 }
  0x15   : > { %s200_s27 = scalar_select %p199_p10, %s1920_s19, 1  ;;  %1734 = vmatpush3.bf16.msra.mxu0 %v1731_v17 }
  0x16   : > { %1742 = vmatpush3.bf16.msra.mxu1 %v1739_v23  ;;  %1744 = vmatprep.subr.bf16.mxu0 %v2099_v54  ;;  %s2638_s8 = smov (!%p205_p11, %s1548_s8), 15 }
  0x17   : > { %s1759_s28 = smul.u32 160, %s200_s27  ;;  %1752 = vmatprep.subr.bf16.mxu1 %v2114_v58  ;;  %s1549_s12 = sshll.u32 %s2638_s8, 3 }
  0x18   : > { %s2371_s23 = scalar_lea.vmem %s2629_s3, %s1549_s12  ;;  %s1871_s27 = smov 32  }
  0x19   : > { %s1958_s9 = scalar_lea.vmem %s2626_s0, %s1759_s28  ;;  %s1596_s28 = sshll.u32 %s1920_s19, 5 }
  0x1a   : > { %v210_v3 = vld [vmem:[%s1958_s9] sm:$0xff]  ;;  %v1962_v4 = vld [vmem:[%s1958_s9 + $0x10] sm:$0xff]  ;;  %v1970_v7 = vld [vmem:[%s1958_s9 + $0x18] sm:$0x3]  ;;  %s1873_s12 = smov [#allocation2]  }
  0x1b   : > { %280 = vrot.lane.b32.xlu1 %v210_v3, %s1868_s10  ;;  %v239_v5 = vrot.slane %v1962_v4, 7  ;;  %v1967_v6 = vld [vmem:[%s1958_s9 + $0x20] sm:$0xff]  ;;  %v211_v8 = vld [vmem:[%s1958_s9 + $0x8] sm:$0x3]  ;;  %v639_v10 = vrot.slane %v1970_v7, 7  ;;  %v328_v15 = vrot.slane %v210_v3, 7 }
  0x1c   : > { %v240_v9 = vrot.slane %v1967_v6, 7  ;;  %v1991_v16 = vld [vmem:[%s1958_s9 + $0x28] sm:$0x3]  ;;  %v2006_v24 = vld [vmem:[%s1958_s9 + $0x30] sm:$0xff]  ;;  %v679_v25 = vrot.slane %v211_v8, 7  ;;  %v2014_v28 = vld [vmem:[%s1958_s9 + $0x40] sm:$0xff] }
  0x1d   : > { %247 = vrot.lane.b32.xlu0 %v239_v5, %s1869_s11  ;;  %v640_v12 = vsel %vm638_vm0, %v239_v5, %v639_v10  ;;  %v641_v22 = vrot.slane %v1991_v16, 7  ;;  %v241_v27 = vrot.slane %v2006_v24, 7  ;;  %v242_v30 = vrot.slane %v2014_v28, 7  ;;  %v2023_v31 = vld [vmem:[%s1958_s9 + $0x38] sm:$0x3]  ;;  %v2041_v36 = vld [vmem:[%s1958_s9 + $0x50] sm:$0xff] }
  0x1e   : > { %v680_v29 = vsel %vm638_vm0, %v328_v15, %v679_v25  ;;  %v643_v32 = vrot.slane %v2023_v31, 7  ;;  %v2035_v34 = vld [vmem:[%s1958_s9 + $0x48] sm:$0x3]  ;;  %v243_v38 = vrot.slane %v2041_v36, 7  ;;  %v2049_v39 = vld [vmem:[%s1958_s9 + $0x60] sm:$0xff]  ;;  %v2075_v46 = vld [vmem:[%s1958_s9 + $0x70] sm:$0xff] }
  0x1f   : > { %282 = vrot.lane.b32.xlu1 %v211_v8, %s1868_s10  ;;  %v642_v26 = vsel %vm638_vm0, %v240_v9, %v641_v22  ;;  %v645_v35 = vrot.slane %v2035_v34, 7  ;;  %v244_v40 = vrot.slane %v2049_v39, 7  ;;  %v2057_v41 = vld [vmem:[%s1958_s9 + $0x58] sm:$0x3]  ;;  %v2069_v44 = vld [vmem:[%s1958_s9 + $0x68] sm:$0x3] }
  0x20   : > { %v644_v33 = vsel %vm638_vm0, %v241_v27, %v643_v32  ;;  %v647_v42 = vrot.slane %v2057_v41, 7  ;;  %v649_v45 = vrot.slane %v2069_v44, 7  ;;  %v245_v48 = vrot.slane %v2075_v46, 7  ;;  %v2083_v49 = vld [vmem:[%s1958_s9 + $0x80] sm:$0xff]  ;;  %v2091_v51 = vld [vmem:[%s1958_s9 + $0x78] sm:$0x3] }
  0x21   : > { %249 = vrot.lane.b32.xlu0 %v240_v9, %s1869_s11  ;;  %v646_v37 = vsel %vm638_vm0, %v242_v30, %v645_v35  ;;  %v246_v50 = vrot.slane %v2083_v49, 7  ;;  %v651_v55 = vrot.slane %v2091_v51, 7  ;;  %v2120_v60 = vld [vmem:[%s1958_s9 + $0x88] sm:$0x3]  ;;  %v2132_v63 = vld [vmem:[%s1958_s9 + $0x98] sm:$0x3] }
  0x22   : > { %v648_v43 = vsel %vm638_vm0, %v243_v38, %v647_v42  ;;  %v650_v47 = vsel %vm638_vm0, %v244_v40, %v649_v45  ;;  %v653_v61 = vrot.slane %v2120_v60, 7  ;;  %v2135_v0 = vld [vmem:[%s1958_s9 + $0x90] sm:$0xff]  ;;  %v1212_v1 = vrot.slane %v2132_v63, 7  ;;  %v1574_v32 = vld [vmem:[%s2627_s1 + $0x58] sm:$0xff]  ;;  %s196_s9 = sand.u32 1, %s1858_s16   ;;  %s1808_s13 = sshll.u32 %s1873_s12, 4  ;;  %s1809_s13 = int_to_ptr.vmem [resolvable:$false] %s1808_s13 }
  0x23   : > { %284 = vrot.lane.b32.xlu1 %v1962_v4, %s1868_s10  ;;  %v652_v59 = vsel %vm638_vm0, %v245_v48, %v651_v55  ;;  %v982_v2 = vrot.slane %v2135_v0, 7  ;;  %s1441_s19 = scalar_lea.sflag [#allocation3], %s196_s9  ;;  %s1810_s14 = scalar_lea.vmem %s1809_s13, 64 }
  0x24   : > { %v654_v62 = vsel %vm638_vm0, %v246_v50, %v653_v61 }
  0x25   : > { %655 = vrot.lane.b32.xlu0 %v640_v12, %s1869_s11  ;;  %v1213_v3 = vsel %vm638_vm0, %v982_v2, %v1212_v1 }
  0x27   : > { %329 = vrot.lane.b32.xlu1 %v328_v15, %s1870_s7 }
  0x29   : > { %286 = vrot.lane.b32.xlu0 %v1970_v7, %s1868_s10 }
  0x2b   : > { %331 = vrot.lane.b32.xlu1 %v239_v5, %s1870_s7 }
  0x2d   : > { %657 = vrot.lane.b32.xlu0 %v642_v26, %s1869_s11 }
  0x2f   : > { %251 = vrot.lane.b32.xlu1 %v241_v27, %s1869_s11 }
  0x31   : > { %681 = vrot.lane.b32.xlu0 %v680_v29, %s1870_s7 }
  0x33   : > { %253 = vrot.lane.b32.xlu1 %v242_v30, %s1869_s11 }
  0x35   : > { %683 = vrot.lane.b32.xlu0 %v640_v12, %s1870_s7 }
  0x37   : > { %290 = vrot.lane.b32.xlu1 %v1991_v16, %s1868_s10 }
  0x39   : > { %288 = vrot.lane.b32.xlu0 %v1967_v6, %s1868_s10 }
  0x3b   : > { %292 = vrot.lane.b32.xlu1 %v2006_v24, %s1868_s10 }
  0x3d   : > { %659 = vrot.lane.b32.xlu0 %v644_v33, %s1869_s11 }
  0x3f   : > { %333 = vrot.lane.b32.xlu1 %v240_v9, %s1870_s7 }
  0x41   : > { %294 = vrot.lane.b32.xlu0 %v2023_v31, %s1868_s10 }
  0x43   : > { %335 = vrot.lane.b32.xlu1 %v241_v27, %s1870_s7 }
  0x45   : > { %661 = vrot.lane.b32.xlu0 %v646_v37, %s1869_s11 }
  0x47   : > { %255 = vrot.lane.b32.xlu1 %v243_v38, %s1869_s11 }
  0x49   : > { %685 = vrot.lane.b32.xlu0 %v642_v26, %s1870_s7 }
  0x4b   : > { %257 = vrot.lane.b32.xlu1 %v244_v40, %s1869_s11 }
  0x4d   : > { %687 = vrot.lane.b32.xlu0 %v644_v33, %s1870_s7 }
  0x4f   : > { %298 = vrot.lane.b32.xlu1 %v2035_v34, %s1868_s10 }
  0x51   : > { %296 = vrot.lane.b32.xlu0 %v2014_v28, %s1868_s10 }
  0x53   : > { %300 = vrot.lane.b32.xlu1 %v2041_v36, %s1868_s10 }
  0x55   : > { %663 = vrot.lane.b32.xlu0 %v648_v43, %s1869_s11 }
  0x57   : > { %337 = vrot.lane.b32.xlu1 %v242_v30, %s1870_s7 }
  0x59   : > { %302 = vrot.lane.b32.xlu0 %v2057_v41, %s1868_s10 }
  0x5b   : > { %339 = vrot.lane.b32.xlu1 %v243_v38, %s1870_s7 }
  0x5d   : > { %665 = vrot.lane.b32.xlu0 %v650_v47, %s1869_s11 }
  0x5f   : > { %259 = vrot.lane.b32.xlu1 %v245_v48, %s1869_s11 }
  0x61   : > { %689 = vrot.lane.b32.xlu0 %v646_v37, %s1870_s7 }
  0x63   : > { %261 = vrot.lane.b32.xlu1 %v246_v50, %s1869_s11 }
  0x65   : > { %691 = vrot.lane.b32.xlu0 %v648_v43, %s1870_s7 }
  0x67   : > { %306 = vrot.lane.b32.xlu1 %v2069_v44, %s1868_s10 }
  0x69   : > { %304 = vrot.lane.b32.xlu0 %v2049_v39, %s1868_s10 }
  0x6b   : > { %308 = vrot.lane.b32.xlu1 %v2075_v46, %s1868_s10 }
  0x6d   : > { %667 = vrot.lane.b32.xlu0 %v652_v59, %s1869_s11 }
  0x6f   : > { %341 = vrot.lane.b32.xlu1 %v244_v40, %s1870_s7 }
  0x71   : > { %310 = vrot.lane.b32.xlu0 %v2091_v51, %s1868_s10 }
  0x73   : > { %343 = vrot.lane.b32.xlu1 %v245_v48, %s1870_s7 }
  0x75   : > { %669 = vrot.lane.b32.xlu0 %v654_v62, %s1869_s11 }
  0x77   : > { %695 = vrot.lane.b32.xlu1 %v652_v59, %s1870_s7 }
  0x79   : > { %693 = vrot.lane.b32.xlu0 %v650_v47, %s1870_s7 }
  0x7b   : > { %986 = vrot.lane.b32.xlu1 %v2083_v49, %s1868_s10 }
  0x7d   : > { %983 = vrot.lane.b32.xlu0 %v982_v2, %s1869_s11 }
  0x7f   : > { %1214 = vrot.lane.b32.xlu1 %v1213_v3, %s1869_s11  ;;  %s1546_s11 = sshll.u32 %s196_s9, 1 }
  0x80   : > { %s198_s29 = scalar_lea.vmem [#allocation2], %s1546_s11 }
  0x81   : > { %988 = vrot.lane.b32.xlu0 %v2120_v60, %s1868_s10  ;;  %s1458_s30 = sshll.u32 %s198_s29, 4  ;;  %s2541_s30 = int_to_ptr.vmem [resolvable:$true] %s1458_s30 }
  0x82   : > { %s1804_s8 = scalar_lea.vmem %s2541_s30, 32  ;;  %p1811_p1 = scmp.lt.s32.totalorder %s2541_s30, %s1809_s13 }
  0x83   : > { %1217 = vrot.lane.b32.xlu1 %v654_v62, %s1870_s7  ;;  %p1805_p12 = scmp.ne.s32.totalorder %s2541_s30, %s1804_s8  ;;  %p1812_p2 = scmp.lt.s32.totalorder %s1810_s14, %s1804_s8 }
  0x85   : > { %992 = vrot.lane.b32.xlu0 %v246_v50, %s1870_s7  ;;  %s2539_s7 = scalar_lea.hbm %s2630_s4, %s1596_s28  ;;  %p1806_p13 = pnand %p1805_p12, %p1937_p5 }
  0x86   : > { %p1813_p3 = por %p1812_p2, %p1811_p1 }
  0x87   : > { %p1807_p0 = pneg %p1806_p13 }
  0x89   : > { %p1814_p4 = pnand %p1813_p3, %p1807_p0 }
  0x8d   : > { %v281_v5 = vpop.permute.xlu1 %280 }
  0x8f   : > { %v248_v8 = vpop.permute.xlu0 %247 }
  0x90   : > { %v354_v12 = vsel %vm353_vm1, %v1962_v4, %v248_v8  ;;  %v355_v13 = vsel %vm353_vm1, %v1970_v7, %v248_v8 }
  0x91   : > { %v283_v9 = vpop.permute.xlu1 %282  ;;  %v371_v17 = vsel %vm370_vm2, %v354_v12, %v281_v5 }
  0x92   : > { %v372_v15 = vsel %vm370_vm2, %v355_v13, %v283_v9 }
  0x93   : > { %v250_v10 = vpop.permute.xlu0 %249 }
  0x94   : > { %v356_v19 = vsel %vm353_vm1, %v1967_v6, %v250_v10  ;;  %v357_v4 = vsel %vm353_vm1, %v1991_v16, %v250_v10  ;;  %v1573_v6 = vld [vmem:[%s2627_s1 + $0x50] sm:$0xff] }
  0x95   : > { %v285_v11 = vpop.permute.xlu1 %284  ;;  %v1747_v43 = vpack.c.bf16 %v1574_v32, %v1573_v6 }
  0x96   : > { %v373_v27 = vsel %vm370_vm2, %v356_v19, %v285_v11 }
  0x97   : > { %v656_v14 = vpop.permute.xlu0 %655 }
  0x98   : > { %v705_v42 = vsel %vm353_vm1, %v1970_v7, %v656_v14 }
  0x99   : > { %v330_v18 = vpop.permute.xlu1 %329  ;;  %v713_v48 = vsel %vm370_vm2, %v705_v42, %v283_v9 }
  0x9a   : > { %v388_v20 = vsel %vm387_vm3, %v371_v17, %v330_v18  ;;  %v389_v21 = vsel %vm387_vm3, %v372_v15, %v330_v18 }
  0x9b   : > { %v421_v22 = vrot.slane %v388_v20, 1  ;;  %v422_v23 = vrot.slane %v389_v21, 1  ;;  %v287_v25 = vpop.permute.xlu0 %286  ;;  %v738_v7 = vrot.slane %v388_v20, 2 }
  0x9c   : > { %v374_v26 = vsel %vm370_vm2, %v357_v4, %v287_v25 }
  0x9d   : > { %v332_v29 = vpop.permute.xlu1 %331  ;;  %v423_v30 = vsel %vm420_vm4, %v421_v22, %v422_v23 }
  0x9e   : > { %v390_v33 = vsel %vm387_vm3, %v373_v27, %v332_v29  ;;  %v391_v35 = vsel %vm387_vm3, %v374_v26, %v332_v29  ;;  %1655 = vmatprep.mubr.msk.f32.mxu0 %vm455_vm5, %v423_v30 }
  0x9f   : > { %v424_v37 = vrot.slane %v390_v33, 1  ;;  %v425_v38 = vrot.slane %v391_v35, 1  ;;  %v658_v40 = vpop.permute.xlu0 %657  ;;  %v741_v1 = vrot.slane %v390_v33, 2 }
  0xa0   : > { %v706_v52 = vsel %vm353_vm1, %v1991_v16, %v658_v40  ;;  %v1586_v16 = vld [vmem:[%s2627_s1 + $0x78] sm:$0xff] }
  0xa1   : > { %v252_v45 = vpop.permute.xlu1 %251  ;;  %v2177_v47 = vsel %vm420_vm4, %v424_v37, %v425_v38  ;;  %v714_v57 = vsel %vm370_vm2, %v706_v52, %v287_v25 }
  0xa2   : > { %1656 = vmatmul.mubr.msk.f32.vlgmr.msra.gmra.mrb[0].mxu0 %vm455_vm5, %v2177_v47  ;;  %v358_v12 = vsel %vm353_vm1, %v2006_v24, %v252_v45  ;;  %v359_v13 = vsel %vm353_vm1, %v2023_v31, %v252_v45 }
  0xa3   : > { %v682_v50 = vpop.permute.xlu0 %681  ;;  %1746 = vmatpush3.bf16.msra.mxu0 %v2099_v54  ;;  %v1585_v54 = vld [vmem:[%s2627_s1 + $0x70] sm:$0xff] }
  0xa4   : > { %v721_v53 = vsel %vm387_vm3, %v713_v48, %v682_v50  ;;  %1748 = vmatprep.subr.bf16.mxu0 %v1747_v43  ;;  %v1755_v5 = vpack.c.bf16 %v1586_v16, %v1585_v54 }
  0xa5   : > { %v739_v55 = vrot.slane %v721_v53, 2  ;;  %v254_v56 = vpop.permute.xlu1 %253 }
  0xa6   : > { %v360_v24 = vsel %vm353_vm1, %v2014_v28, %v254_v56 }
  0xa7   : > { %v684_v59 = vpop.permute.xlu0 %683  ;;  %v740_v61 = vsel %vm737_vm6, %v738_v7, %v739_v55  ;;  %1750 = vmatpush3.bf16.msra.mxu0 %v1747_v43 }
  0xa8   : > { %v722_v62 = vsel %vm387_vm3, %v714_v57, %v684_v59  ;;  %1675 = vmatprep.mubr.msk.f32.mxu1 %vm455_vm5, %v740_v61 }
  0xa9   : > { %v742_v2 = vrot.slane %v722_v62, 2  ;;  %v291_v3 = vpop.permute.xlu1 %290 }
  0xaa   : > { %v376_v14 = vsel %vm370_vm2, %v359_v13, %v291_v3 }
  0xab   : > { %v289_v8 = vpop.permute.xlu0 %288  ;;  %v2197_v9 = vsel %vm737_vm6, %v741_v1, %v742_v2 }
  0xac   : > { %1676 = vmatmul.mubr.msk.f32.vlgmr.msra.gmra.mrb[0].mxu1 %vm455_vm5, %v2197_v9  ;;  %v375_v15 = vsel %vm370_vm2, %v358_v12, %v289_v8 }
  0xad   : > { %v293_v10 = vpop.permute.xlu1 %292  ;;  %1754 = vmatpush3.bf16.msra.mxu1 %v2114_v58  ;;  %v361_v58 = vsel %vm353_vm1, %v2035_v34, %v254_v56 }
  0xae   : > { %1756 = vmatprep.subr.bf16.mxu1 %v1755_v5  ;;  %v377_v23 = vsel %vm370_vm2, %v360_v24, %v293_v10 }
  0xaf   : > { %v660_v11 = vpop.permute.xlu0 %659 }
  0xb0   : > { %v707_v28 = vsel %vm353_vm1, %v2023_v31, %v660_v11 }
  0xb1   : > { %v334_v17 = vpop.permute.xlu1 %333  ;;  %1758 = vmatpush3.bf16.msra.mxu1 %v1755_v5  ;;  %v715_v37 = vsel %vm370_vm2, %v707_v28, %v291_v3 }
  0xb2   : > { %v392_v18 = vsel %vm387_vm3, %v375_v15, %v334_v17  ;;  %v393_v19 = vsel %vm387_vm3, %v376_v14, %v334_v17 }
  0xb3   : > { %v427_v20 = vrot.slane %v392_v18, 1  ;;  %v428_v21 = vrot.slane %v393_v19, 1  ;;  %v295_v4 = vpop.permute.xlu0 %294  ;;  %v744_v43 = vrot.slane %v392_v18, 2 }
  0xb4   : > { %v378_v22 = vsel %vm370_vm2, %v361_v58, %v295_v4 }
  0xb5   : > { %v336_v25 = vpop.permute.xlu1 %335  ;;  %v2217_v26 = vsel %vm420_vm4, %v427_v20, %v428_v21 }
  0xb6   : > { %v394_v27 = vsel %vm387_vm3, %v377_v23, %v336_v25  ;;  %v395_v29 = vsel %vm387_vm3, %v378_v22, %v336_v25  ;;  %1658 = vmatprep.mubr.msk.f32.mxu0 %vm455_vm5, %v2217_v26 }
  0xb7   : > { %v430_v30 = vrot.slane %v394_v27, 1  ;;  %v431_v6 = vrot.slane %v395_v29, 1  ;;  %v662_v32 = vpop.permute.xlu0 %661  ;;  %v747_v7 = vrot.slane %v394_v27, 2 }
  0xb8   : > { %v708_v40 = vsel %vm353_vm1, %v2035_v34, %v662_v32 }
  0xb9   : > { %v256_v33 = vpop.permute.xlu1 %255  ;;  %v2226_v35 = vsel %vm420_vm4, %v430_v30, %v431_v6  ;;  %v716_v31 = vsel %vm370_vm2, %v708_v40, %v295_v4 }
  0xba   : > { %1659 = vmatmul.mubr.msk.f32.gmra.mrb[2].mxu0 %vm455_vm5, %v2226_v35  ;;  %v362_v54 = vsel %vm353_vm1, %v2041_v36, %v256_v33  ;;  %v363_v16 = vsel %vm353_vm1, %v2057_v41, %v256_v33 }
  0xbb   : > { %v686_v38 = vpop.permute.xlu0 %685 }
  0xbc   : > { %v723_v42 = vsel %vm387_vm3, %v715_v37, %v686_v38 }
  0xbd   : > { %v745_v45 = vrot.slane %v723_v42, 2  ;;  %v258_v48 = vpop.permute.xlu1 %257 }
  0xbe   : > { %v365_v8 = vsel %vm353_vm1, %v2069_v44, %v258_v48  ;;  %v364_v36 = vsel %vm353_vm1, %v2049_v39, %v258_v48 }
  0xbf   : > { %v688_v50 = vpop.permute.xlu0 %687  ;;  %v2236_v52 = vsel %vm737_vm6, %v744_v43, %v745_v45 }
  0xc0   : > { %v724_v53 = vsel %vm387_vm3, %v716_v31, %v688_v50  ;;  %1678 = vmatprep.mubr.msk.f32.mxu1 %vm455_vm5, %v2236_v52 }
  0xc1   : > { %v748_v55 = vrot.slane %v724_v53, 2  ;;  %v299_v56 = vpop.permute.xlu1 %298 }
  0xc2   : > { %v380_v62 = vsel %vm370_vm2, %v363_v16, %v299_v56 }
  0xc3   : > { %v297_v34 = vpop.permute.xlu0 %296  ;;  %v2242_v57 = vsel %vm737_vm6, %v747_v7, %v748_v55 }
  0xc4   : > { %1679 = vmatmul.mubr.msk.f32.gmra.mrb[2].mxu1 %vm455_vm5, %v2242_v57  ;;  %v379_v1 = vsel %vm370_vm2, %v362_v54, %v297_v34 }
  0xc5   : > { %v301_v59 = vpop.permute.xlu1 %300 }
  0xc6   : > { %v381_v14 = vsel %vm370_vm2, %v364_v36, %v301_v59 }
  0xc7   : > { %v664_v61 = vpop.permute.xlu0 %663 }
  0xc8   : > { %v709_v39 = vsel %vm353_vm1, %v2057_v41, %v664_v61 }
  0xc9   : > { %v338_v2 = vpop.permute.xlu1 %337  ;;  %v717_v22 = vsel %vm370_vm2, %v709_v39, %v299_v56 }
  0xca   : > { %v396_v3 = vsel %vm387_vm3, %v379_v1, %v338_v2  ;;  %v397_v5 = vsel %vm387_vm3, %v380_v62, %v338_v2 }
  0xcb   : > { %v433_v10 = vrot.slane %v396_v3, 1  ;;  %v434_v11 = vrot.slane %v397_v5, 1  ;;  %v303_v12 = vpop.permute.xlu0 %302  ;;  %v750_v29 = vrot.slane %v396_v3, 2 }
  0xcc   : > { %v382_v13 = vsel %vm370_vm2, %v365_v8, %v303_v12 }
  0xcd   : > { %v340_v15 = vpop.permute.xlu1 %339  ;;  %v2261_v17 = vsel %vm420_vm4, %v433_v10, %v434_v11 }
  0xce   : > { %v398_v18 = vsel %vm387_vm3, %v381_v14, %v340_v15  ;;  %v399_v19 = vsel %vm387_vm3, %v382_v13, %v340_v15  ;;  %1661 = vmatprep.mubr.msk.f32.mxu0 %vm455_vm5, %v2261_v17 }
  0xcf   : > { %v436_v58 = vrot.slane %v398_v18, 1  ;;  %v437_v20 = vrot.slane %v399_v19, 1  ;;  %v666_v21 = vpop.permute.xlu0 %665  ;;  %v753_v37 = vrot.slane %v398_v18, 2 }
  0xd0   : > { %v710_v25 = vsel %vm353_vm1, %v2069_v44, %v666_v21 }
  0xd1   : > { %v260_v4 = vpop.permute.xlu1 %259  ;;  %v2270_v24 = vsel %vm420_vm4, %v436_v58, %v437_v20  ;;  %v718_v41 = vsel %vm370_vm2, %v710_v25, %v303_v12 }
  0xd2   : > { %1662 = vmatmul.mubr.msk.f32.gmra.mrb[4].mxu0 %vm455_vm5, %v2270_v24  ;;  %v366_v48 = vsel %vm353_vm1, %v2075_v46, %v260_v4  ;;  %v367_v31 = vsel %vm353_vm1, %v2091_v51, %v260_v4 }
  0xd3   : > { %v690_v23 = vpop.permute.xlu0 %689 }
  0xd4   : > { %v725_v27 = vsel %vm387_vm3, %v717_v22, %v690_v23 }
  0xd5   : > { %v751_v30 = vrot.slane %v725_v27, 2  ;;  %v262_v6 = vpop.permute.xlu1 %261 }
  0xd6   : > { %v369_v34 = vsel %vm353_vm1, %v2120_v60, %v262_v6  ;;  %v368_v46 = vsel %vm353_vm1, %v2083_v49, %v262_v6 }
  0xd7   : > { %v692_v32 = vpop.permute.xlu0 %691  ;;  %v2280_v28 = vsel %vm737_vm6, %v750_v29, %v751_v30 }
  0xd8   : > { %v726_v33 = vsel %vm387_vm3, %v718_v41, %v692_v32  ;;  %1681 = vmatprep.mubr.msk.f32.mxu1 %vm455_vm5, %v2280_v28 }
  0xd9   : > { %v754_v38 = vrot.slane %v726_v33, 2  ;;  %v307_v40 = vpop.permute.xlu1 %306 }
  0xda   : > { %v384_v50 = vsel %vm370_vm2, %v367_v31, %v307_v40 }
  0xdb   : > { %v305_v44 = vpop.permute.xlu0 %304  ;;  %v2286_v42 = vsel %vm737_vm6, %v753_v37, %v754_v38 }
  0xdc   : > { %1682 = vmatmul.mubr.msk.f32.gmra.mrb[4].mxu1 %vm455_vm5, %v2286_v42  ;;  %v383_v53 = vsel %vm370_vm2, %v366_v48, %v305_v44 }
  0xdd   : > { %v309_v43 = vpop.permute.xlu1 %308 }
  0xde   : > { %v385_v62 = vsel %vm370_vm2, %v368_v46, %v309_v43 }
  0xdf   : > { %v668_v45 = vpop.permute.xlu0 %667 }
  0xe0   : > { %v711_v12 = vsel %vm353_vm1, %v2091_v51, %v668_v45 }
  0xe1   : > { %v342_v7 = vpop.permute.xlu1 %341  ;;  %v719_v18 = vsel %vm370_vm2, %v711_v12, %v307_v40 }
  0xe2   : > { %v400_v55 = vsel %vm387_vm3, %v383_v53, %v342_v7  ;;  %v401_v56 = vsel %vm387_vm3, %v384_v50, %v342_v7 }
  0xe3   : > { %v439_v59 = vrot.slane %v400_v55, 1  ;;  %v440_v61 = vrot.slane %v401_v56, 1  ;;  %v311_v54 = vpop.permute.xlu0 %310  ;;  %v756_v20 = vrot.slane %v400_v55, 2 }
  0xe4   : > { %v386_v16 = vsel %vm370_vm2, %v369_v34, %v311_v54 }
  0xe5   : > { %v344_v1 = vpop.permute.xlu1 %343  ;;  %v441_v2 = vsel %vm420_vm4, %v439_v59, %v440_v61 }
  0xe6   : > { %v402_v3 = vsel %vm387_vm3, %v385_v62, %v344_v1  ;;  %v403_v5 = vsel %vm387_vm3, %v386_v16, %v344_v1  ;;  %1664 = vmatprep.mubr.msk.f32.mxu0 %vm455_vm5, %v441_v2 }
  0xe7   : > { %v442_v8 = vrot.slane %v402_v3, 1  ;;  %v443_v10 = vrot.slane %v403_v5, 1  ;;  %v670_v11 = vpop.permute.xlu0 %669  ;;  %v759_v39 = vrot.slane %v402_v3, 2 }
  0xe8   : > { %v712_v49 = vsel %vm353_vm1, %v2120_v60, %v670_v11 }
  0xe9   : > { %v696_v36 = vpop.permute.xlu1 %695  ;;  %v720_v13 = vsel %vm370_vm2, %v712_v49, %v311_v54  ;;  %v444_v14 = vsel %vm420_vm4, %v442_v8, %v443_v10 }
  0xea   : > { %v728_v15 = vsel %vm387_vm3, %v720_v13, %v696_v36  ;;  %1665 = vmatmul.mubr.msk.f32.gmra.mrb[6].mxu0 %vm455_vm5, %v444_v14 }
  0xeb   : > { %1695 = vmatprep.mubr.msk.f32.mxu0 %vm455_vm5, %v2177_v47  ;;  %v694_v19 = vpop.permute.xlu0 %693  ;;  %v760_v58 = vrot.slane %v728_v15, 2 }
  0xec   : > { %v727_v51 = vsel %vm387_vm3, %v719_v18, %v694_v19 }
  0xed   : > { %v757_v60 = vrot.slane %v727_v51, 2  ;;  %v987_v21 = vpop.permute.xlu1 %986  ;;  %v761_v47 = vsel %vm737_vm6, %v759_v39, %v760_v58 }
  0xee   : > { %1696 = vmatmul.mubr.msk.f32.vlgmr.msra.gmra.mrb[8].mxu0 %vm455_vm5, %v2217_v26 }
  0xef   : > { %1698 = vmatprep.mubr.msk.f32.mxu0 %vm455_vm5, %v2226_v35  ;;  %v984_v4 = vpop.permute.xlu0 %983  ;;  %v758_v22 = vsel %vm737_vm6, %v756_v20, %v757_v60 }
  0xf0   : > { %1684 = vmatprep.mubr.msk.f32.mxu1 %vm455_vm5, %v758_v22  ;;  %v995_v25 = vsel %vm353_vm1, %v2135_v0, %v984_v4  ;;  %v996_v27 = vsel %vm353_vm1, %v2132_v63, %v984_v4 }
  0xf1   : > { %1685 = vmatmul.mubr.msk.f32.gmra.mrb[6].mxu1 %vm455_vm5, %v761_v47  ;;  %v1215_v23 = vpop.permute.xlu1 %1214  ;;  %v997_v30 = vsel %vm370_vm2, %v995_v25, %v987_v21 }
  0xf2   : > { %1699 = vmatmul.mubr.msk.f32.gmra.mrb[10].mxu0 %vm455_vm5, %v2261_v17  ;;  %1715 = vmatprep.mubr.msk.f32.mxu1 %vm455_vm5, %v2197_v9  ;;  %v1220_v26 = vsel %vm353_vm1, %v2132_v63, %v1215_v23 }
  0xf3   : > { %1701 = vmatprep.mubr.msk.f32.mxu0 %vm455_vm5, %v2270_v24  ;;  %v989_v35 = vpop.permute.xlu0 %988 }
  0xf4   : > { %v1221_v29 = vsel %vm370_vm2, %v1220_v26, %v989_v35  ;;  %v998_v0 = vsel %vm370_vm2, %v996_v27, %v989_v35 }
  0xf5   : > { %1716 = vmatmul.mubr.msk.f32.vlgmr.msra.gmra.mrb[8].mxu1 %vm455_vm5, %v2236_v52  ;;  %v1218_v17 = vpop.permute.xlu1 %1217 }
  0xf6   : > { %1702 = vmatmul.mubr.msk.f32.gmra.mrb[12].mxu0 %vm455_vm5, %v441_v2  ;;  %1718 = vmatprep.mubr.msk.f32.mxu1 %vm455_vm5, %v2242_v57  ;;  %v1222_v9 = vsel %vm387_vm3, %v1221_v29, %v1218_v17 }
  0xf7   : > { %1704 = vmatprep.mubr.msk.f32.mxu0 %vm455_vm5, %v444_v14  ;;  %v993_v63 = vpop.permute.xlu0 %992  ;;  %v1225_v57 = vrot.slane %v1222_v9, 2 }
  0xf8   : > { %v999_v24 = vsel %vm387_vm3, %v997_v30, %v993_v63  ;;  %v1000_v6 = vsel %vm387_vm3, %v998_v0, %v993_v63 }
  0xf9   : > { %v1003_v41 = vrot.slane %v999_v24, 1  ;;  %v1004_v32 = vrot.slane %v1000_v6, 1  ;;  %1719 = vmatmul.mubr.msk.f32.gmra.mrb[10].mxu1 %vm455_vm5, %v2280_v28  ;;  %v1224_v52 = vrot.slane %v999_v24, 2  ;;  %v2366_v28 = vld [vmem:[%s2628_s2] ss:$0 sm:$0xff] }
  0xfa   : > { %1721 = vmatprep.mubr.msk.f32.mxu1 %vm455_vm5, %v2286_v42 }
  0xfb   : > { %v1005_v33 = vsel %vm420_vm4, %v1003_v41, %v1004_v32  ;;  %v1226_v37 = vsel %vm737_vm6, %v1224_v52, %v1225_v57 }
  0xfc   : > { %1705 = vmatmul.mubr.msk.f32.gmra.mrb[14].mxu0 %vm455_vm5, %v1005_v33 }
  0xfd   : > { %1722 = vmatmul.mubr.msk.f32.gmra.mrb[12].mxu1 %vm455_vm5, %v758_v22 }
  0xfe   : > { %1724 = vmatprep.mubr.msk.f32.mxu1 %vm455_vm5, %v761_v47 }
 0x101   : > { %1725 = vmatmul.mubr.msk.f32.gmra.mrb[14].mxu1 %vm455_vm5, %v1226_v37 }
 0x175   : > { %v1657_v38 = vpop.f32.mrb[0].mxu0 }
 0x176   : > { %v544_v40 = vadd.f32 %v1657_v38, %v2366_v28  ;;  %v538_v44 = vpop.f32.mrb[1].mxu0 }
 0x177   : > { %v539_v42 = vadd.f32 %v2366_v28, %v538_v44 }
 0x178   : > { %578 = vst.msk [vmem:[%s2371_s23 + $0x8] sm:$0xff] %vm370_vm2, %v544_v40  ;;  %v586_v43 = vsel %vm370_vm2, %v544_v40, 0.0  ;;  %v608_v45 = vmul.f32 %v544_v40, %v544_v40 }
 0x179   : > { %577 = vst.msk [vmem:[%s2371_s23] sm:$0xff] %vm370_vm2, %v539_v42  ;;  %v585_v48 = vsel %vm370_vm2, %v539_v42, 0.0  ;;  %v607_v31 = vmul.f32 %v539_v42, %v539_v42 }
 0x17a   : > { %v616_v50 = vsel %vm370_vm2, %v608_v45, 0.0  ;;  %v587_v53 = vadd.f32 %v586_v43, %v585_v48 }
 0x17b   : > { %v615_v7 = vsel %vm370_vm2, %v607_v31, 0.0 }
 0x17c   : > { %v617_v55 = vadd.f32 %v616_v50, %v615_v7 }
 0x17f   : > { %v1677_v56 = vpop.f32.mrb[0].mxu1 }
 0x180   : > { %v855_v34 = vadd.f32 %v1677_v56, %v2366_v28  ;;  %v849_v59 = vpop.f32.mrb[1].mxu1 }
 0x181   : > { %v850_v61 = vadd.f32 %v2366_v28, %v849_v59 }
 0x182   : > { %v930_v54 = vsel %vm370_vm2, %v855_v34, 0.0  ;;  %v952_v46 = vmul.f32 %v855_v34, %v855_v34  ;;  %898 = vrot.lane.b32.xlu1 %v855_v34, %s1868_s10 }
 0x183   : > { %v929_v16 = vsel %vm370_vm2, %v850_v61, 0.0  ;;  %v951_v62 = vmul.f32 %v850_v61, %v850_v61  ;;  %896 = vrot.lane.b32.xlu0 %v850_v61, %s1868_s10 }
 0x184   : > { %v960_v1 = vsel %vm370_vm2, %v952_v46, 0.0  ;;  %v931_v2 = vadd.f32 %v930_v54, %v929_v16 }
 0x185   : > { %v959_v3 = vsel %vm370_vm2, %v951_v62, 0.0 }
 0x186   : > { %v961_v5 = vadd.f32 %v960_v1, %v959_v3 }
 0x18d   : > { %v1660_v8 = vpop.f32.mrb[2].mxu0 }
 0x18e   : > { %v554_v10 = vadd.f32 %v1660_v8, %v2366_v28  ;;  %v548_v11 = vpop.f32.mrb[3].mxu0 }
 0x18f   : > { %v549_v12 = vadd.f32 %v2366_v28, %v548_v11 }
 0x190   : > { %580 = vst.msk [vmem:[%s2371_s23 + $0x18] sm:$0xff] %vm370_vm2, %v554_v10  ;;  %v610_v49 = vmul.f32 %v554_v10, %v554_v10  ;;  %v590_v15 = vsel %vm370_vm2, %v554_v10, 0.0 }
 0x191   : > { %579 = vst.msk [vmem:[%s2371_s23 + $0x10] sm:$0xff] %vm370_vm2, %v549_v12  ;;  %v588_v36 = vsel %vm370_vm2, %v549_v12, 0.0  ;;  %v609_v13 = vmul.f32 %v549_v12, %v549_v12 }
 0x192   : > { %v589_v14 = vadd.f32 %v588_v36, %v587_v53  ;;  %v620_v51 = vsel %vm370_vm2, %v610_v49, 0.0 }
 0x193   : > { %v618_v18 = vsel %vm370_vm2, %v609_v13, 0.0 }
 0x194   : > { %v619_v19 = vadd.f32 %v618_v18, %v617_v55  ;;  %v591_v58 = vadd.f32 %v590_v15, %v589_v14 }
 0x196   : > { %v621_v20 = vadd.f32 %v620_v51, %v619_v19 }
 0x197   : > { %v1680_v60 = vpop.f32.mrb[2].mxu1 }
 0x198   : > { %v865_v21 = vadd.f32 %v1680_v60, %v2366_v28  ;;  %v859_v39 = vpop.f32.mrb[3].mxu1 }
 0x199   : > { %v860_v4 = vadd.f32 %v2366_v28, %v859_v39 }
 0x19a   : > { %902 = vrot.lane.b32.xlu1 %v865_v21, %s1868_s10  ;;  %v954_v22 = vmul.f32 %v865_v21, %v865_v21  ;;  %v934_v27 = vsel %vm370_vm2, %v865_v21, 0.0 }
 0x19b   : > { %v932_v47 = vsel %vm370_vm2, %v860_v4, 0.0  ;;  %v953_v23 = vmul.f32 %v860_v4, %v860_v4  ;;  %900 = vrot.lane.b32.xlu0 %v860_v4, %s1868_s10 }
 0x19c   : > { %v933_v25 = vadd.f32 %v932_v47, %v931_v2  ;;  %v964_v0 = vsel %vm370_vm2, %v954_v22, 0.0 }
 0x19d   : > { %v962_v26 = vsel %vm370_vm2, %v953_v23, 0.0 }
 0x19e   : > { %v963_v35 = vadd.f32 %v962_v26, %v961_v5  ;;  %v935_v29 = vadd.f32 %v934_v27, %v933_v25 }
 0x1a0   : > { %v965_v30 = vadd.f32 %v964_v0, %v963_v35 }
 0x1a5   : > { %v1663_v17 = vpop.f32.mrb[4].mxu0 }
 0x1a6   : > { %v564_v63 = vadd.f32 %v1663_v17, %v2366_v28  ;;  %v558_v9 = vpop.f32.mrb[5].mxu0 }
 0x1a7   : > { %v559_v24 = vadd.f32 %v2366_v28, %v558_v9 }
 0x1a8   : > { %582 = vst.msk [vmem:[%s2371_s23 + $0x28] sm:$0xff] %vm370_vm2, %v564_v63  ;;  %v612_v6 = vmul.f32 %v564_v63, %v564_v63  ;;  %v594_v57 = vsel %vm370_vm2, %v564_v63, 0.0 }
 0x1a9   : > { %581 = vst.msk [vmem:[%s2371_s23 + $0x20] sm:$0xff] %vm370_vm2, %v559_v24  ;;  %v592_v41 = vsel %vm370_vm2, %v559_v24, 0.0  ;;  %v611_v32 = vmul.f32 %v559_v24, %v559_v24 }
 0x1aa   : > { %v593_v52 = vadd.f32 %v592_v41, %v591_v58  ;;  %v624_v40 = vsel %vm370_vm2, %v612_v6, 0.0 }
 0x1ab   : > { %v622_v33 = vsel %vm370_vm2, %v611_v32, 0.0 }
 0x1ac   : > { %v623_v37 = vadd.f32 %v622_v33, %v621_v20  ;;  %v595_v38 = vadd.f32 %v594_v57, %v593_v52 }
 0x1ae   : > { %v625_v44 = vadd.f32 %v624_v40, %v623_v37 }
 0x1af   : > { %v1683_v42 = vpop.f32.mrb[4].mxu1 }
 0x1b0   : > { %v875_v43 = vadd.f32 %v1683_v42, %v2366_v28  ;;  %v869_v45 = vpop.f32.mrb[5].mxu1 }
 0x1b1   : > { %v870_v48 = vadd.f32 %v2366_v28, %v869_v45 }
 0x1b2   : > { %906 = vrot.lane.b32.xlu1 %v875_v43, %s1868_s10  ;;  %v956_v31 = vmul.f32 %v875_v43, %v875_v43  ;;  %v938_v55 = vsel %vm370_vm2, %v875_v43, 0.0 }
 0x1b3   : > { %v936_v50 = vsel %vm370_vm2, %v870_v48, 0.0  ;;  %v955_v53 = vmul.f32 %v870_v48, %v870_v48  ;;  %904 = vrot.lane.b32.xlu0 %v870_v48, %s1868_s10 }
 0x1b4   : > { %v937_v7 = vadd.f32 %v936_v50, %v935_v29  ;;  %v968_v61 = vsel %vm370_vm2, %v956_v31, 0.0 }
 0x1b5   : > { %v966_v56 = vsel %vm370_vm2, %v955_v53, 0.0 }
 0x1b6   : > { %v967_v34 = vadd.f32 %v966_v56, %v965_v30  ;;  %v939_v59 = vadd.f32 %v938_v55, %v937_v7 }
 0x1b8   : > { %v2427_v54 = vadd.f32 %v968_v61, %v967_v34 }
 0x1bd   : > { %v1666_v46 = vpop.f32.mrb[6].mxu0 }
 0x1be   : > { %v574_v16 = vadd.f32 %v1666_v46, %v2366_v28  ;;  %v568_v62 = vpop.f32.mrb[7].mxu0 }
 0x1bf   : > { %v569_v1 = vadd.f32 %v2366_v28, %v568_v62 }
 0x1c0   : > { %584 = vst.msk [vmem:[%s2371_s23 + $0x38] sm:$0xff] %vm370_vm2, %v574_v16  ;;  %v614_v2 = vmul.f32 %v574_v16, %v574_v16  ;;  %v598_v49 = vsel %vm370_vm2, %v574_v16, 0.0 }
 0x1c1   : > { %583 = vst.msk [vmem:[%s2371_s23 + $0x30] sm:$0xff] %vm370_vm2, %v569_v1  ;;  %v596_v3 = vsel %vm370_vm2, %v569_v1, 0.0  ;;  %v613_v5 = vmul.f32 %v569_v1, %v569_v1  ;;  %v1697_v8 = vpop.f32.mrb[8].mxu0 }
 0x1c2   : > { %v597_v10 = vadd.f32 %v596_v3, %v595_v38  ;;  %v1085_v11 = vadd.f32 %v1697_v8, %v2366_v28  ;;  %v1079_v12 = vpop.f32.mrb[9].mxu0  ;;  %v628_v51 = vsel %vm370_vm2, %v614_v2, 0.0 }
 0x1c3   : > { %v626_v36 = vsel %vm370_vm2, %v613_v5, 0.0  ;;  %v1080_v13 = vadd.f32 %v2366_v28, %v1079_v12 }
 0x1c4   : > { %v599_v14 = vadd.f32 %v598_v49, %v597_v10  ;;  %v627_v15 = vadd.f32 %v626_v36, %v625_v44  ;;  %v1160_v18 = vsel %vm370_vm2, %v1085_v11, 0.0  ;;  %v1182_v19 = vmul.f32 %v1085_v11, %v1085_v11  ;;  %v1686_v58 = vpop.f32.mrb[6].mxu1 }
 0x1c5   : > { %v1159_v20 = vsel %vm370_vm2, %v1080_v13, 0.0  ;;  %v1181_v60 = vmul.f32 %v1080_v13, %v1080_v13  ;;  %v885_v21 = vadd.f32 %v1686_v58, %v2366_v28  ;;  %v879_v39 = vpop.f32.mrb[7].mxu1  ;;  %v1700_v4 = vpop.f32.mrb[10].mxu0 }
 0x1c6   : > { %v600_v22 = vrot.slane %v599_v14, 4  ;;  %v629_v47 = vadd.f32 %v628_v51, %v627_v15  ;;  %v1190_v23 = vsel %vm370_vm2, %v1182_v19, 0.0  ;;  %v1161_v25 = vadd.f32 %v1160_v18, %v1159_v20  ;;  %v1089_v27 = vpop.f32.mrb[11].mxu0 }
 0x1c7   : > { %v1189_v26 = vsel %vm370_vm2, %v1181_v60, 0.0  ;;  %v958_v35 = vmul.f32 %v885_v21, %v885_v21  ;;  %v880_v29 = vadd.f32 %v2366_v28, %v879_v39  ;;  %910 = vrot.lane.b32.xlu1 %v885_v21, %s1868_s10  ;;  %v1095_v63 = vadd.f32 %v1700_v4, %v2366_v28 }
 0x1c8   : > { %v601_v0 = vadd.f32 %v600_v22, %v599_v14  ;;  %v630_v30 = vrot.slane %v629_v47, 4  ;;  %v1191_v17 = vadd.f32 %v1190_v23, %v1189_v26  ;;  %v1717_v9 = vpop.f32.mrb[8].mxu1  ;;  %v942_v24 = vsel %vm370_vm2, %v885_v21, 0.0 }
 0x1c9   : > { %v940_v6 = vsel %vm370_vm2, %v880_v29, 0.0  ;;  %v957_v41 = vmul.f32 %v880_v29, %v880_v29  ;;  %v2452_v32 = vadd.f32 %v2366_v28, %v1089_v27  ;;  %908 = vrot.lane.b32.xlu0 %v880_v29, %s1868_s10  ;;  %v1703_v52 = vpop.f32.mrb[12].mxu0  ;;  %v1300_v57 = vpop.f32.mrb[9].mxu1  ;;  %v972_v38 = vsel %vm370_vm2, %v958_v35, 0.0  ;;  %s1872_s10 = smov 48  }
 0x1ca   : > { %v602_v33 = vrot.slane %v601_v0, 2  ;;  %v631_v37 = vadd.f32 %v630_v30, %v629_v47  ;;  %v941_v40 = vadd.f32 %v940_v6, %v939_v59  ;;  %v1099_v44 = vpop.f32.mrb[13].mxu0  ;;  %v1184_v43 = vmul.f32 %v1095_v63, %v1095_v63 }
 0x1cb   : > { %v970_v42 = vsel %vm370_vm2, %v957_v41, 0.0  ;;  %v1162_v45 = vsel %vm370_vm2, %v2452_v32, 0.0  ;;  %v1183_v48 = vmul.f32 %v2452_v32, %v2452_v32  ;;  %1128 = vrot.lane.b32.xlu1 %v1085_v11, %s1871_s27  ;;  %v1164_v56 = vsel %vm370_vm2, %v1095_v63, 0.0 }
 0x1cc   : > { %v603_v31 = vadd.f32 %v602_v33, %v601_v0  ;;  %v632_v50 = vrot.slane %v631_v37, 2  ;;  %v943_v53 = vadd.f32 %v942_v24, %v941_v40  ;;  %v971_v7 = vadd.f32 %v970_v42, %v2427_v54  ;;  %v1720_v55 = vpop.f32.mrb[10].mxu1 }
 0x1cd   : > { %v1163_v34 = vadd.f32 %v1162_v45, %v1161_v25  ;;  %v1192_v59 = vsel %vm370_vm2, %v1183_v48, 0.0  ;;  %v1306_v61 = vadd.f32 %v1717_v9, %v2366_v28  ;;  %1126 = vrot.lane.b32.xlu0 %v1080_v13, %s1871_s27  ;;  %v1310_v46 = vpop.f32.mrb[11].mxu1  ;;  %v1194_v3 = vsel %vm370_vm2, %v1184_v43, 0.0 }
 0x1ce   : > { %v604_v16 = vrot.slane %v603_v31, 1  ;;  %v633_v62 = vadd.f32 %v632_v50, %v631_v37  ;;  %v944_v1 = vrot.slane %v943_v53, 4  ;;  %v973_v2 = vadd.f32 %v972_v38, %v971_v7 }
 0x1cf   : > { %v1193_v5 = vadd.f32 %v1192_v59, %v1191_v17  ;;  %v1403_v8 = vmul.f32 %v1306_v61, %v1306_v61  ;;  %v2469_v54 = vadd.f32 %v1703_v52, %v2366_v28  ;;  %1349 = vrot.lane.b32.xlu1 %v1306_v61, %s1872_s10  ;;  %v1706_v10 = vpop.f32.mrb[14].mxu0  ;;  %v1381_v36 = vsel %vm370_vm2, %v1306_v61, 0.0 }
 0x1d0   : > { %v634_v11 = vrot.slane %v633_v62, 1  ;;  %v945_v12 = vadd.f32 %v944_v1, %v943_v53  ;;  %v974_v49 = vrot.slane %v973_v2, 4  ;;  %v1723_v13 = vpop.f32.mrb[12].mxu1  ;;  %v1109_v14 = vpop.f32.mrb[15].mxu0  ;;  %v2473_v15 = vadd.f32 %v604_v16, %v603_v31 }
 0x1d1   : > { %v1411_v18 = vsel %vm370_vm2, %v1403_v8, 0.0  ;;  %v1168_v19 = vsel %vm370_vm2, %v2469_v54, 0.0  ;;  %v1301_v58 = vadd.f32 %v2366_v28, %v1300_v57  ;;  %v1320_v51 = vpop.f32.mrb[13].mxu1  ;;  %v1186_v21 = vmul.f32 %v2469_v54, %v2469_v54 }
 0x1d2   : > { %v946_v20 = vrot.slane %v945_v12, 2  ;;  %v975_v60 = vadd.f32 %v974_v49, %v973_v2  ;;  %v1100_v39 = vadd.f32 %v2366_v28, %v1099_v44  ;;  %v2482_v4 = vadd.f32 %v634_v11, %v633_v62 }
 0x1d3   : > { %v1380_v22 = vsel %vm370_vm2, %v1301_v58, 0.0  ;;  %v1402_v47 = vmul.f32 %v1301_v58, %v1301_v58  ;;  %v1165_v23 = vadd.f32 %v1164_v56, %v1163_v34  ;;  %1347 = vrot.lane.b32.xlu0 %v1301_v58, %s1872_s10  ;;  %1132 = vrot.lane.b32.xlu1 %v1095_v63, %s1871_s27  ;;  %v1195_v9 = vadd.f32 %v1194_v3, %v1193_v5 }
 0x1d4   : > { %v947_v25 = vadd.f32 %v946_v20, %v945_v12  ;;  %v976_v27 = vrot.slane %v975_v60, 2  ;;  %v1382_v26 = vadd.f32 %v1381_v36, %v1380_v22  ;;  %v1166_v35 = vsel %vm370_vm2, %v1100_v39, 0.0  ;;  %v1726_v29 = vpop.f32.mrb[14].mxu1 }
 0x1d5   : > { %v1410_v0 = vsel %vm370_vm2, %v1402_v47, 0.0  ;;  %v1167_v30 = vadd.f32 %v1166_v35, %v1165_v23  ;;  %v1185_v17 = vmul.f32 %v1100_v39, %v1100_v39  ;;  %v1330_v24 = vpop.f32.mrb[15].mxu1  ;;  %v1316_v57 = vadd.f32 %v1720_v55, %v2366_v28 }
 0x1d6   : > { %v948_v6 = vrot.slane %v947_v25, 1  ;;  %v977_v41 = vadd.f32 %v976_v27, %v975_v60  ;;  %v1412_v52 = vadd.f32 %v1411_v18, %v1410_v0  ;;  %v1311_v63 = vadd.f32 %v2366_v28, %v1310_v46 }
 0x1d7   : > { %v1196_v33 = vsel %vm370_vm2, %v1185_v17, 0.0  ;;  %v1115_v37 = vadd.f32 %v1706_v10, %v2366_v28  ;;  %v1326_v38 = vadd.f32 %v1723_v13, %v2366_v28  ;;  %1130 = vrot.lane.b32.xlu0 %v2452_v32, %s1871_s27  ;;  %v1198_v42 = vsel %vm370_vm2, %v1186_v21, 0.0  ;;  %1353 = vrot.lane.b32.xlu1 %v1316_v57, %s1872_s10 }
 0x1d8   : > { %v949_v40 = vadd.f32 %v948_v6, %v947_v25  ;;  %v978_v44 = vrot.slane %v977_v41, 1  ;;  %v1197_v43 = vadd.f32 %v1196_v33, %v1195_v9  ;;  %v1385_v45 = vsel %vm370_vm2, %v1316_v57, 0.0 }
 0x1d9   : > { %v1405_v48 = vmul.f32 %v1316_v57, %v1316_v57  ;;  %v1383_v31 = vsel %vm370_vm2, %v1311_v63, 0.0  ;;  %v1404_v50 = vmul.f32 %v1311_v63, %v1311_v63  ;;  %v1172_v55 = vsel %vm370_vm2, %v1115_v37, 0.0 }
 0x1da   : > { %v979_v53 = vadd.f32 %v978_v44, %v977_v41  ;;  %v1384_v7 = vadd.f32 %v1383_v31, %v1382_v26  ;;  %v1188_v56 = vmul.f32 %v1115_v37, %v1115_v37  ;;  %v1389_v59 = vsel %vm370_vm2, %v1326_v38, 0.0 }
 0x1db   : > { %v1415_v32 = vsel %vm370_vm2, %v1405_v48, 0.0  ;;  %v1413_v34 = vsel %vm370_vm2, %v1404_v50, 0.0  ;;  %v1110_v61 = vadd.f32 %v2366_v28, %v1109_v14  ;;  %1351 = vrot.lane.b32.xlu0 %v1311_v63, %s1872_s10  ;;  %v1407_v16 = vmul.f32 %v1326_v38, %v1326_v38  ;;  %1136 = vrot.lane.b32.xlu1 %v2469_v54, %s1871_s27 }
 0x1dc   : > { %v1414_v46 = vadd.f32 %v1413_v34, %v1412_v52  ;;  %v1169_v62 = vadd.f32 %v1168_v19, %v1167_v30  ;;  %v1199_v1 = vadd.f32 %v1198_v42, %v1197_v43  ;;  %v1202_v2 = vsel %vm370_vm2, %v1188_v56, 0.0 }
 0x1dd   : > { %v1170_v3 = vsel %vm370_vm2, %v1110_v61, 0.0  ;;  %v1187_v5 = vmul.f32 %v1110_v61, %v1110_v61  ;;  %v1321_v8 = vadd.f32 %v2366_v28, %v1320_v51  ;;  %v1386_v11 = vadd.f32 %v1385_v45, %v1384_v7 }
 0x1de   : > { %v1171_v10 = vadd.f32 %v1170_v3, %v1169_v62  ;;  %v1416_v12 = vadd.f32 %v1415_v32, %v1414_v46  ;;  %v1336_v49 = vadd.f32 %v1726_v29, %v2366_v28  ;;  %v1331_v18 = vadd.f32 %v2366_v28, %v1330_v24 }
 0x1df   : > { %v1200_v36 = vsel %vm370_vm2, %v1187_v5, 0.0  ;;  %v1387_v13 = vsel %vm370_vm2, %v1321_v8, 0.0  ;;  %v1406_v14 = vmul.f32 %v1321_v8, %v1321_v8  ;;  %1134 = vrot.lane.b32.xlu0 %v1100_v39, %s1871_s27  ;;  %v1419_v54 = vsel %vm370_vm2, %v1407_v16, 0.0  ;;  %1357 = vrot.lane.b32.xlu1 %v1326_v38, %s1872_s10 }
 0x1e0   : > { %v1173_v19 = vadd.f32 %v1172_v55, %v1171_v10  ;;  %v1201_v58 = vadd.f32 %v1200_v36, %v1199_v1  ;;  %v1388_v20 = vadd.f32 %v1387_v13, %v1386_v11  ;;  %v1409_v60 = vmul.f32 %v1336_v49, %v1336_v49 }
 0x1e1   : > { %v1417_v51 = vsel %vm370_vm2, %v1406_v14, 0.0  ;;  %v1391_v21 = vsel %vm370_vm2, %v1331_v18, 0.0  ;;  %v1408_v22 = vmul.f32 %v1331_v18, %v1331_v18  ;;  %v1393_v28 = vsel %vm370_vm2, %v1336_v49, 0.0 }
 0x1e2   : > { %v1174_v47 = vrot.slane %v1173_v19, 4  ;;  %v1203_v23 = vadd.f32 %v1202_v2, %v1201_v58  ;;  %v1418_v25 = vadd.f32 %v1417_v51, %v1416_v12  ;;  %v1390_v27 = vadd.f32 %v1389_v59, %v1388_v20 }
 0x1e3   : > { %v1421_v39 = vsel %vm370_vm2, %v1408_v22, 0.0  ;;  %1355 = vrot.lane.b32.xlu0 %v1321_v8, %s1872_s10  ;;  %v950_v26 = vadd.f32 %v949_v40, %v2473_v15  ;;  %v980_v35 = vadd.f32 %v979_v53, %v2482_v4  ;;  %1140 = vrot.lane.b32.xlu1 %v1115_v37, %s1871_s27  ;;  %v1423_v9 = vsel %vm370_vm2, %v1409_v60, 0.0 }
 0x1e4   : > { %v1175_v29 = vadd.f32 %v1174_v47, %v1173_v19  ;;  %v1204_v0 = vrot.slane %v1203_v23, 4  ;;  %v1392_v30 = vadd.f32 %v1391_v21, %v1390_v27  ;;  %v1420_v17 = vadd.f32 %v1419_v54, %v1418_v25 }
 0x1e6   : > { %v1176_v24 = vrot.slane %v1175_v29, 2  ;;  %v1205_v6 = vadd.f32 %v1204_v0, %v1203_v23  ;;  %v1394_v41 = vadd.f32 %v1393_v28, %v1392_v30  ;;  %v1422_v52 = vadd.f32 %v1421_v39, %v1420_v17 }
 0x1e7   : > { %1138 = vrot.lane.b32.xlu0 %v1110_v61, %s1871_s27  ;;  %1361 = vrot.lane.b32.xlu1 %v1336_v49, %s1872_s10 }
 0x1e8   : > { %v1177_v57 = vadd.f32 %v1176_v24, %v1175_v29  ;;  %v1206_v33 = vrot.slane %v1205_v6, 2  ;;  %v1395_v15 = vrot.slane %v1394_v41, 4  ;;  %v1424_v63 = vadd.f32 %v1423_v9, %v1422_v52 }
 0x1ea   : > { %v1178_v4 = vrot.slane %v1177_v57, 1  ;;  %v1207_v38 = vadd.f32 %v1206_v33, %v1205_v6  ;;  %v1396_v40 = vadd.f32 %v1395_v15, %v1394_v41  ;;  %v1425_v44 = vrot.slane %v1424_v63, 4 }
 0x1eb   : > { %1359 = vrot.lane.b32.xlu0 %v1331_v18, %s1872_s10 }
 0x1ec   : > { %v1179_v37 = vadd.f32 %v1178_v4, %v1177_v57  ;;  %v1208_v42 = vrot.slane %v1207_v38, 1  ;;  %v1397_v43 = vrot.slane %v1396_v40, 2  ;;  %v1426_v45 = vadd.f32 %v1425_v44, %v1424_v63 }
 0x1ee   : > { %v1398_v48 = vadd.f32 %v1397_v43, %v1396_v40  ;;  %v1427_v31 = vrot.slane %v1426_v45, 2  ;;  %v1180_v50 = vadd.f32 %v1179_v37, %v950_v26  ;;  %v1209_v53 = vadd.f32 %v1208_v42, %v1207_v38 }
 0x1f0   : > { %v1399_v7 = vrot.slane %v1398_v48, 1  ;;  %v1428_v55 = vadd.f32 %v1427_v31, %v1426_v45  ;;  %v1210_v56 = vadd.f32 %v1209_v53, %v980_v35 }
 0x1f2   : > { %v1400_v32 = vadd.f32 %v1399_v7, %v1398_v48  ;;  %v1429_v34 = vrot.slane %v1428_v55, 1 }
 0x1f4   : > { %v899_v59 = vpop.permute.xlu1 %898  ;;  %v1401_v61 = vadd.f32 %v1400_v32, %v1180_v50  ;;  %v1430_v46 = vadd.f32 %v1429_v34, %v1428_v55 }
 0x1f5   : > { %922 = vst.msk [vmem:[%s2371_s23 + $0x8] sm:$0xff] %vm920_vm7, %v899_v59  ;;  %v897_v16 = vpop.permute.xlu0 %896 }
 0x1f6   : > { %921 = vst.msk [vmem:[%s2371_s23] sm:$0xff] %vm920_vm7, %v897_v16  ;;  %v1431_v62 = vadd.f32 %v1430_v46, %v1210_v56 }
 0x1f8   : > { %v1432_v1 = vsel %vm638_vm0, %v1401_v61, %v1431_v62 }
 0x1f9   : > { %1434 = vst.msk [vmem:[%s198_s29] sm:$0x3] %vm1433_vm8, %v1432_v1 }
 0x1fa   : > { %1817 = shalt.err (!%p1814_p4)
}
 0x1fb   : > { %s1818_s20 = scalar_lea.hbm %s2539_s7, 32  ;;  %s1822_s10 = scalar_lea.hbm %s2630_s4, 64 }
 0x1fc   : > { %p1819_p7 = scmp.ne.s32.totalorder %s2539_s7, %s1818_s20  ;;  %p1823_p10 = scmp.lt.u32.totalorder %s2539_s7, %s2630_s4 }
 0x1fd   : > { %p1824_p11 = scmp.lt.u32.totalorder %s1822_s10, %s1818_s20  ;;  %p1826_p13 = scmp.lt.u32.totalorder %s1818_s20, %s2539_s7 }
 0x1fe   : > { %p1820_p8 = pnand %p1819_p7, %p1937_p5 }
 0x1ff   : > { %p1825_p12 = por %p1824_p11, %p1823_p10 }
 0x200   : > { %p1821_p9 = pneg %p1820_p8 }
 0x201   : > { %p1827_p0 = por %p1826_p13, %p1825_p12 }
 0x203   : > { %p1828_p1 = pnand %p1827_p0, %p1821_p9 }
 0x205   : > { %1831 = shalt.err (!%p1828_p1)
}
 0x206   : > { %1760 = dma.vmem_to_hbm [thread:$0]  (%p1937_p5), %s2541_s30, 32, %s2539_s7, %s1441_s19   ;;  %vm1150_vm9 = vcmask 392448   ;;  %vm1371_vm10 = vcmask 523648  }
 0x20c   : > { %v903_v2 = vpop.permute.xlu1 %902 }
 0x20d   : > { %924 = vst.msk [vmem:[%s2371_s23 + $0x18] sm:$0xff] %vm920_vm7, %v903_v2  ;;  %v901_v3 = vpop.permute.xlu0 %900 }
 0x20e   : > { %923 = vst.msk [vmem:[%s2371_s23 + $0x10] sm:$0xff] %vm920_vm7, %v901_v3 }
 0x224   : > { %v907_v5 = vpop.permute.xlu1 %906 }
 0x225   : > { %926 = vst.msk [vmem:[%s2371_s23 + $0x28] sm:$0xff] %vm920_vm7, %v907_v5  ;;  %v905_v8 = vpop.permute.xlu0 %904 }
 0x226   : > { %925 = vst.msk [vmem:[%s2371_s23 + $0x20] sm:$0xff] %vm920_vm7, %v905_v8 }
 0x239   : > { %v911_v10 = vpop.permute.xlu1 %910 }
 0x23a   : > { %928 = vst.msk [vmem:[%s2371_s23 + $0x38] sm:$0xff] %vm920_vm7, %v911_v10 }
 0x23b   : > { %v909_v11 = vpop.permute.xlu0 %908 }
 0x23c   : > { %927 = vst.msk [vmem:[%s2371_s23 + $0x30] sm:$0xff] %vm920_vm7, %v909_v11 }
 0x23d   : > { %v1129_v12 = vpop.permute.xlu1 %1128 }
 0x23e   : > { %1152 = vst.msk [vmem:[%s2371_s23 + $0x8] sm:$0xff] %vm1150_vm9, %v1129_v12 }
 0x23f   : > { %v1127_v49 = vpop.permute.xlu0 %1126 }
 0x240   : > { %1151 = vst.msk [vmem:[%s2371_s23] sm:$0xff] %vm1150_vm9, %v1127_v49 }
 0x241   : > { %v1350_v36 = vpop.permute.xlu1 %1349 }
 0x242   : > { %1373 = vst.msk [vmem:[%s2371_s23 + $0x8] sm:$0xff] %vm1371_vm10, %v1350_v36 }
 0x245   : > { %v1348_v13 = vpop.permute.xlu0 %1347  ;;  %v1133_v14 = vpop.permute.xlu1 %1132 }
 0x246   : > { %1372 = vst.msk [vmem:[%s2371_s23] sm:$0xff] %vm1371_vm10, %v1348_v13 }
 0x247   : > { %1154 = vst.msk [vmem:[%s2371_s23 + $0x18] sm:$0xff] %vm1150_vm9, %v1133_v14 }
 0x249   : > { %v1131_v18 = vpop.permute.xlu0 %1130  ;;  %v1354_v54 = vpop.permute.xlu1 %1353 }
 0x24a   : > { %1153 = vst.msk [vmem:[%s2371_s23 + $0x10] sm:$0xff] %vm1150_vm9, %v1131_v18 }
 0x24b   : > { %1375 = vst.msk [vmem:[%s2371_s23 + $0x18] sm:$0xff] %vm1371_vm10, %v1354_v54 }
 0x24d   : > { %v1352_v19 = vpop.permute.xlu0 %1351  ;;  %v1137_v58 = vpop.permute.xlu1 %1136 }
 0x24e   : > { %1374 = vst.msk [vmem:[%s2371_s23 + $0x10] sm:$0xff] %vm1371_vm10, %v1352_v19 }
 0x24f   : > { %1156 = vst.msk [vmem:[%s2371_s23 + $0x28] sm:$0xff] %vm1150_vm9, %v1137_v58 }
 0x251   : > { %v1135_v20 = vpop.permute.xlu0 %1134  ;;  %v1358_v51 = vpop.permute.xlu1 %1357 }
 0x252   : > { %1155 = vst.msk [vmem:[%s2371_s23 + $0x20] sm:$0xff] %vm1150_vm9, %v1135_v20 }
 0x253   : > { %1377 = vst.msk [vmem:[%s2371_s23 + $0x28] sm:$0xff] %vm1371_vm10, %v1358_v51 }
 0x255   : > { %v1356_v60 = vpop.permute.xlu0 %1355  ;;  %v1141_v21 = vpop.permute.xlu1 %1140 }
 0x256   : > { %1376 = vst.msk [vmem:[%s2371_s23 + $0x20] sm:$0xff] %vm1371_vm10, %v1356_v60 }
 0x257   : > { %1158 = vst.msk [vmem:[%s2371_s23 + $0x38] sm:$0xff] %vm1150_vm9, %v1141_v21 }
 0x259   : > { %v1139_v22 = vpop.permute.xlu0 %1138  ;;  %v1362_v47 = vpop.permute.xlu1 %1361 }
 0x25a   : > { %1157 = vst.msk [vmem:[%s2371_s23 + $0x30] sm:$0xff] %vm1150_vm9, %v1139_v22 }
 0x25b   : > { %1379 = vst.msk [vmem:[%s2371_s23 + $0x38] sm:$0xff] %vm1371_vm10, %v1362_v47 }
 0x25d   : > { %v1360_v23 = vpop.permute.xlu0 %1359 }
 0x25e   : > { %1378 = vst.msk [vmem:[%s2371_s23 + $0x30] sm:$0xff] %vm1371_vm10, %v1360_v23 }
 0x25f PF: > { %p1766_p5 = scmp.ge.s32.totalorder %s1866_s18, 2  ;;  %s1478_s25 = sand.u32 1, %s1854_s15  }
 0x260   : > { %s1479_s28 = scalar_lea.sflag [#allocation3], %s1478_s25 }
 0x261   : > { %p1763_p2 = pnand %p1766_p5, %p1941_p6 }
 0x263   : > { %1849 = dma.done.wait (!%p1763_p2), %s1479_s28, 32  }
 0x264   : > { %1851 = vsyncadd (!%p1763_p2), %s1479_s28, 4294967264  ;;  %p15_p3 = scmp.ge.s32.totalorder %s1924_s21, 4   ;;  %s2633_s15 = smov %s1858_s16 }
 0x265   : > { %s2634_s16 = smov %s1862_s17  ;;  %s2635_s17 = smov %s1935_s24 }
 0x266   : > { %s2636_s18 = smov %s1924_s21  ;;  %17 = sbr.rel (!%p15_p3) target bundleno = 3 (0x3), region = 82 }
 0x26d   :  { %1484 = vsyncpa [#allocation3], 1 }
 0x26e   :  { %1486 = vsyncpa [#allocation3 + $0x1], 1 }

</bundles_post_ra>
